<compile_context>
chip_gen: v7x
topology: tpu7x:2x2x1
jax: 0.10.0
libtpu: 0.0.40
codegen_flags: <defaults>
</compile_context>

<pallas_src>
import functools

import jax
import jax.numpy as jnp
from jax.experimental import pallas as pl
from jax.experimental.pallas import tpu as pltpu


def _round_up(x, m):
    return (x + m - 1) // m * m


def _vmem_capacity_bytes():
    """Per-core VMEM capacity; conservative default if the query is unavailable."""
    try:
        return int(pltpu.get_tpu_info().vmem_capacity_bytes)
    except Exception:
        return 64 * 1024 * 1024  # v7x per-TC VMEM (smallest of v5e/v6e/v7x)


# ---------------------------------------------------------------------------
# Fast path: VMEM-resident table, one grid step per tile of TB bags.
# ---------------------------------------------------------------------------
def _resident_kernel(idx_ref, scr_ref, w_ref, out_ref, *, row_chunk):
    idx = idx_ref[...]                       # (TB, K) int32, VMEM
    scr = scr_ref[...]                       # (TB, K) f32,   VMEM
    tb, n_keys = idx.shape
    size = w_ref.shape[0]

    # (1, S) iota broadcast against (rc, 1) index columns -> (rc, S) compares.
    lane_ids = jax.lax.broadcasted_iota(jnp.int32, (1, size), 1)
    w = w_ref[...]                           # (S, D) bf16, resident (no f32 cast)

    # Chunked, register-resident scatter build: each (rc, S) f32 accumulator is
    # only a handful of vregs, so the unrolled K loop never round-trips a full
    # (TB, S) buffer through VMEM.  f32 build keeps v5e (no bf16 VALU) happy
    # and matches the reference's f32 score accumulation for duplicate indices.
    # TODO(synk): build the chunks natively in bf16 on v6e/v7x (packed VALU)
    # once per-generation dispatch is plumbed through.
    for r0 in range(0, tb, row_chunk):
        rc = min(row_chunk, tb - r0)
        m = jnp.zeros((rc, size), jnp.float32)
        for k in range(n_keys):
            idx_k = idx[r0:r0 + rc, k:k + 1]          # (rc, 1)
            scr_k = scr[r0:r0 + rc, k:k + 1]          # (rc, 1)
            m = m + jnp.where(lane_ids == idx_k, scr_k, 0.0)
        # bf16 x bf16 MXU contraction with f32 accumulation (native MXU path;
        # no S*D*4 f32 table temp per tile).
        out_c = jnp.dot(m.astype(w.dtype), w, preferred_element_type=jnp.float32)
        out_ref[r0:r0 + rc, :] = out_c.astype(out_ref.dtype)


def _embedding_bag_resident(indices, scores, weight, *, tb, vmem_limit):
    B, K = indices.shape
    S, D = weight.shape
    Bp = _round_up(B, tb)
    if Bp != B:
        pad = Bp - B
        indices = jnp.pad(indices, ((0, pad), (0, 0)))   # padded bags: scores = 0
        scores = jnp.pad(scores, ((0, pad), (0, 0)))

    row_chunk = 16 if tb % 16 == 0 else 8
    kernel = functools.partial(_resident_kernel, row_chunk=row_chunk)
    cost = pl.CostEstimate(
        flops=2 * Bp * S * D + 3 * Bp * K * S,
        transcendentals=0,
        bytes_accessed=S * D * weight.dtype.itemsize
        + Bp * K * 8 + Bp * D * weight.dtype.itemsize,
    )

    def build(table_spec):
        grid_spec = pltpu.PrefetchScalarGridSpec(
            num_scalar_prefetch=0,
            grid=(Bp // tb,),
            in_specs=[
                pl.BlockSpec((tb, K), lambda i: (i, 0)),     # indices tile
                pl.BlockSpec((tb, K), lambda i: (i, 0)),     # scores tile
                table_spec,                                   # resident table
            ],
            out_specs=pl.BlockSpec((tb, D), lambda i: (i, 0)),
        )
        return pl.pallas_call(
            kernel,
            out_shape=jax.ShapeDtypeStruct((Bp, D), weight.dtype),
            grid_spec=grid_spec,
            compiler_params=pltpu.CompilerParams(
                dimension_semantics=("parallel",),            # megacore/v7x: split bag tiles
                vmem_limit_bytes=vmem_limit),
            cost_estimate=cost,
        )

    # Single-buffer the resident table (constant index map -> fetched once);
    # halves its VMEM footprint vs. default double buffering, which matters on
    # v7x's 64 MiB/TC.  Guarded: fall back to default buffering if this
    # jax/Mosaic version rejects Buffered(1).
    try:
        spec_1buf = pl.BlockSpec((S, D), lambda i: (0, 0),
                                 pipeline_mode=pl.Buffered(1))
        out = build(spec_1buf)(indices, scores, weight)
    except Exception:  # noqa: BLE001 - only Buffered(1) support differs here
        spec_2buf = pl.BlockSpec((S, D), lambda i: (0, 0))
        out = build(spec_2buf)(indices, scores, weight)
    return out[:B] if Bp != B else out


# ---------------------------------------------------------------------------
# Fallback: bag-tiled, manually double-buffered DMA row gather (large vocab).
# Weight stays in HBM; flat indices are scalar-prefetched into SMEM.
# ---------------------------------------------------------------------------
def _gather_kernel(idx_ref, scr_ref, w_hbm, out_ref, rows, sems, *, n_keys):
    i = pl.program_id(0)
    tb, d = out_ref.shape
    base = i * tb * n_keys                    # flat layout: idx[(i*tb+b)*K + k]

    def row_copy(k, b, slot):
        r = idx_ref[base + b * n_keys + k]    # SMEM scalar read (dynamic b)
        return pltpu.make_async_copy(
            w_hbm.at[pl.ds(r, 1), :],
            rows.at[pl.ds(slot * tb + b, 1), :],
            sems.at[slot * tb + b])

    def start_chunk(k, slot):
        @pl.loop(0, tb)
        def _(b):
            row_copy(k, b, slot).start()

    def wait_chunk(k, slot):
        @pl.loop(0, tb)
        def _(b):
            row_copy(k, b, slot).wait()

    start_chunk(0, 0)
    acc = jnp.zeros((tb, d), jnp.float32)     # register-resident accumulator
    for k in range(n_keys):                   # K is small and static: unroll
        slot = k & 1
        if k + 1 < n_keys:
            start_chunk(k + 1, 1 - slot)      # prefetch next key-chunk's rows
        wait_chunk(k, slot)
        w_rows = rows[slot * tb:(slot + 1) * tb, :].astype(jnp.float32)  # (tb, D)
        acc = acc + scr_ref[:, k:k + 1] * w_rows
    out_ref[...] = acc.astype(out_ref.dtype)  # one lane-dense (tb, D) store


def _embedding_bag_gather(indices, scores, weight, *, tb=16):
    B, K = indices.shape
    S, D = weight.shape
    Bp = _round_up(B, tb)
    if Bp != B:
        pad = Bp - B
        indices = jnp.pad(indices, ((0, pad), (0, 0)))
        scores = jnp.pad(scores, ((0, pad), (0, 0)))
    idx_flat = indices.reshape(-1)            # flat 1-D SMEM prefetch array

    grid_spec = pltpu.PrefetchScalarGridSpec(
        num_scalar_prefetch=1,
        grid=(Bp // tb,),
        in_specs=[
            pl.BlockSpec((tb, K), lambda i, idx: (i, 0)),    # scores tile (VMEM)
            pl.BlockSpec(memory_space=pl.ANY),               # weight stays in HBM
        ],
        out_specs=pl.BlockSpec((tb, D), lambda i, idx: (i, 0)),
        scratch_shapes=[
            pltpu.VMEM((2 * tb, D), weight.dtype),           # 2-slot gathered-row buffer
            pltpu.SemaphoreType.DMA((2 * tb,)),
        ],
    )
    cost = pl.CostEstimate(
        flops=2 * Bp * K * D,
        transcendentals=0,
        bytes_accessed=Bp * K * D * weight.dtype.itemsize
        + Bp * D * weight.dtype.itemsize + Bp * K * 8,
    )
    out = pl.pallas_call(
        functools.partial(_gather_kernel, n_keys=K),
        out_shape=jax.ShapeDtypeStruct((Bp, D), weight.dtype),
        grid_spec=grid_spec,
        compiler_params=pltpu.CompilerParams(dimension_semantics=("parallel",)),
        cost_estimate=cost,
    )(idx_flat, scores, weight)
    return out[:B] if Bp != B else out


# ---------------------------------------------------------------------------
# Public entry point.
# ---------------------------------------------------------------------------
def xformer_embedding_bag(indices, scores, weight, *, bag_tile=None,
                          resident_size_cutoff=4096):
    """output[b] = sum_k scores[b,k] * weight[indices[b,k]]  (mode='sum')."""
    B, K = indices.shape
    S, D = weight.shape
    idx_i32 = indices.astype(jnp.int32)
    scr_f32 = scores.astype(jnp.float32)

    if bag_tile is None:
        bag_tile = 128
    tb = max(8, min(_round_up(bag_tile, 8), _round_up(B, 8)))
    row_chunk = 16 if tb % 16 == 0 else 8

    # Residency gating: the one-hot scatter-matmul only pays for small vocabs
    # (its MXU/VPU cost scales with S), so it is gated on both an S cutoff and
    # the VMEM budget of the detected generation (64 MiB/TC on v7x).
    vmem_cap = _vmem_capacity_bytes()
    itemsize = weight.dtype.itemsize
    table_bytes = S * D * itemsize                        # single-buffered resident table
    working = (2 * tb * K * (4 + 4)                       # double-buffered idx/score tiles
               + 2 * tb * D * itemsize                    # double-buffered output tiles
               + 2 * row_chunk * S * 4                    # scatter chunk + compare temp
               + row_chunk * D * 4)                       # per-chunk f32 dot result
    budget = int(0.75 * vmem_cap)

    if S <= resident_size_cutoff and table_bytes + working <= budget:
        # Leave room for the Buffered(1)-unsupported retry (2x table) + headroom.
        vmem_limit = int(min(vmem_cap - (8 << 20),
                             max(32 << 20, 2 * table_bytes + working + (8 << 20))))
        return _embedding_bag_resident(idx_i32, scr_f32, weight,
                                       tb=tb, vmem_limit=vmem_limit)
    return _embedding_bag_gather(idx_i32, scr_f32, weight)


class XFormerEmbeddingBag:
    """JAX mirror of the PyTorch module: holds a (size, dim) bf16 weight."""

    def __init__(self, size, dim, key):
        self.weight = jax.random.normal(key, (size, dim), dtype=jnp.float32).astype(
            jnp.bfloat16)

    def __call__(self, indices, scores):
        return xformer_embedding_bag(indices, scores, self.weight)


if __name__ == "__main__":
    # Small shapes: table size=512, dim=128 (lane-dense), batch=8 bags, bag size K=16.
    SIZE, DIM = 512, 128
    B, K = 8, 16

    root = jax.random.PRNGKey(0)
    k_w, k_idx, k_scr = jax.random.split(root, 3)

    module = XFormerEmbeddingBag(SIZE, DIM, k_w)
    indices = jax.random.randint(k_idx, (B, K), 0, SIZE, dtype=jnp.int32)
    scores = jax.random.normal(k_scr, (B, K), dtype=jnp.float32).astype(jnp.bfloat16)

    out = module(indices, scores)
    out = jax.block_until_ready(out)

    # Pure-JAX reference (gather + weighted sum, f32 accumulation).
    ref = jnp.einsum(
        "bk,bkd->bd",
        scores.astype(jnp.float32),
        module.weight[indices].astype(jnp.float32),
    ).astype(jnp.bfloat16)

    assert out.shape == (B, DIM) and out.dtype == jnp.bfloat16
    err = jnp.max(jnp.abs(out.astype(jnp.float32) - ref.astype(jnp.float32)))
    assert float(err) < 1e-1, f"max abs err {float(err)}"

    print("KERNEL_OK")
</pallas_src>

<mosaic_0001>
module attributes {stable_mosaic.version = 11 : i64} {
  func.func @_resident_kernel(%arg0: i32, %arg1: memref<8x16xi32, #tpu.memory_space<vmem>>, %arg2: memref<8x16xf32, #tpu.memory_space<vmem>>, %arg3: memref<512x128xbf16, #tpu.memory_space<vmem>>, %arg4: memref<8x128xbf16, #tpu.memory_space<vmem>>) attributes {dimension_semantics = [#tpu.dimension_semantics<parallel>], iteration_bounds = array<i64: 1>, scalar_prefetch = 0 : i64, scratch_operands = 0 : i64, tpu.core_type = #tpu.core_type<tc>, window_params = [{transform_indices = @transform_0, window_bounds = array<i64: 8, 16>}, {transform_indices = @transform_1, window_bounds = array<i64: 8, 16>}, {pipeline_mode = #tpu.pipeline_mode<synchronous>, transform_indices = @transform_2, window_bounds = array<i64: 512, 128>}, {transform_indices = @transform_3, window_bounds = array<i64: 8, 128>}]} {
    %c0 = arith.constant 0 : index
    %c0_0 = arith.constant 0 : index
    %0 = vector.load %arg1[%c0, %c0_0] : memref<8x16xi32, #tpu.memory_space<vmem>>, vector<8x16xi32>
    %c0_1 = arith.constant 0 : index
    %c0_2 = arith.constant 0 : index
    %1 = vector.load %arg2[%c0_1, %c0_2] : memref<8x16xf32, #tpu.memory_space<vmem>>, vector<8x16xf32>
    %2 = tpu.iota {dimensions = array<i32: 1>} : vector<1x512xi32>
    %c0_3 = arith.constant 0 : index
    %c0_4 = arith.constant 0 : index
    %3 = vector.load %arg3[%c0_3, %c0_4] : memref<512x128xbf16, #tpu.memory_space<vmem>>, vector<512x128xbf16>
    %cst = arith.constant 0.000000e+00 : f32
    %4 = vector.broadcast %cst : f32 to vector<8x512xf32>
    %5 = vector.extract_strided_slice %0 {offsets = [0, 0], sizes = [8, 1], strides = [1, 1]} : vector<8x16xi32> to vector<8x1xi32>
    %6 = vector.extract_strided_slice %1 {offsets = [0, 0], sizes = [8, 1], strides = [1, 1]} : vector<8x16xf32> to vector<8x1xf32>
    %7 = vector.broadcast %2 : vector<1x512xi32> to vector<8x512xi32>
    %8 = vector.broadcast %5 : vector<8x1xi32> to vector<8x512xi32>
    %9 = arith.cmpi eq, %7, %8 : vector<8x512xi32>
    %cst_5 = arith.constant 0.000000e+00 : f32
    %10 = vector.shape_cast %6 : vector<8x1xf32> to vector<8x1xf32>
    %11 = vector.broadcast %10 : vector<8x1xf32> to vector<8x512xf32>
    %12 = vector.broadcast %cst_5 : f32 to vector<8x512xf32>
    %13 = arith.select %9, %11, %12 : vector<8x512xi1>, vector<8x512xf32>
    %14 = arith.addf %4, %13 : vector<8x512xf32>
    %15 = vector.extract_strided_slice %0 {offsets = [0, 1], sizes = [8, 1], strides = [1, 1]} : vector<8x16xi32> to vector<8x1xi32>
    %16 = vector.extract_strided_slice %1 {offsets = [0, 1], sizes = [8, 1], strides = [1, 1]} : vector<8x16xf32> to vector<8x1xf32>
    %17 = vector.broadcast %2 : vector<1x512xi32> to vector<8x512xi32>
    %18 = vector.broadcast %15 : vector<8x1xi32> to vector<8x512xi32>
    %19 = arith.cmpi eq, %17, %18 : vector<8x512xi32>
    %cst_6 = arith.constant 0.000000e+00 : f32
    %20 = vector.shape_cast %16 : vector<8x1xf32> to vector<8x1xf32>
    %21 = vector.broadcast %20 : vector<8x1xf32> to vector<8x512xf32>
    %22 = vector.broadcast %cst_6 : f32 to vector<8x512xf32>
    %23 = arith.select %19, %21, %22 : vector<8x512xi1>, vector<8x512xf32>
    %24 = arith.addf %14, %23 : vector<8x512xf32>
    %25 = vector.extract_strided_slice %0 {offsets = [0, 2], sizes = [8, 1], strides = [1, 1]} : vector<8x16xi32> to vector<8x1xi32>
    %26 = vector.extract_strided_slice %1 {offsets = [0, 2], sizes = [8, 1], strides = [1, 1]} : vector<8x16xf32> to vector<8x1xf32>
    %27 = vector.broadcast %2 : vector<1x512xi32> to vector<8x512xi32>
    %28 = vector.broadcast %25 : vector<8x1xi32> to vector<8x512xi32>
    %29 = arith.cmpi eq, %27, %28 : vector<8x512xi32>
    %cst_7 = arith.constant 0.000000e+00 : f32
    %30 = vector.shape_cast %26 : vector<8x1xf32> to vector<8x1xf32>
    %31 = vector.broadcast %30 : vector<8x1xf32> to vector<8x512xf32>
    %32 = vector.broadcast %cst_7 : f32 to vector<8x512xf32>
    %33 = arith.select %29, %31, %32 : vector<8x512xi1>, vector<8x512xf32>
    %34 = arith.addf %24, %33 : vector<8x512xf32>
    %35 = vector.extract_strided_slice %0 {offsets = [0, 3], sizes = [8, 1], strides = [1, 1]} : vector<8x16xi32> to vector<8x1xi32>
    %36 = vector.extract_strided_slice %1 {offsets = [0, 3], sizes = [8, 1], strides = [1, 1]} : vector<8x16xf32> to vector<8x1xf32>
    %37 = vector.broadcast %2 : vector<1x512xi32> to vector<8x512xi32>
    %38 = vector.broadcast %35 : vector<8x1xi32> to vector<8x512xi32>
    %39 = arith.cmpi eq, %37, %38 : vector<8x512xi32>
    %cst_8 = arith.constant 0.000000e+00 : f32
    %40 = vector.shape_cast %36 : vector<8x1xf32> to vector<8x1xf32>
    %41 = vector.broadcast %40 : vector<8x1xf32> to vector<8x512xf32>
    %42 = vector.broadcast %cst_8 : f32 to vector<8x512xf32>
    %43 = arith.select %39, %41, %42 : vector<8x512xi1>, vector<8x512xf32>
    %44 = arith.addf %34, %43 : vector<8x512xf32>
    %45 = vector.extract_strided_slice %0 {offsets = [0, 4], sizes = [8, 1], strides = [1, 1]} : vector<8x16xi32> to vector<8x1xi32>
    %46 = vector.extract_strided_slice %1 {offsets = [0, 4], sizes = [8, 1], strides = [1, 1]} : vector<8x16xf32> to vector<8x1xf32>
    %47 = vector.broadcast %2 : vector<1x512xi32> to vector<8x512xi32>
    %48 = vector.broadcast %45 : vector<8x1xi32> to vector<8x512xi32>
    %49 = arith.cmpi eq, %47, %48 : vector<8x512xi32>
    %cst_9 = arith.constant 0.000000e+00 : f32
    %50 = vector.shape_cast %46 : vector<8x1xf32> to vector<8x1xf32>
    %51 = vector.broadcast %50 : vector<8x1xf32> to vector<8x512xf32>
    %52 = vector.broadcast %cst_9 : f32 to vector<8x512xf32>
    %53 = arith.select %49, %51, %52 : vector<8x512xi1>, vector<8x512xf32>
    %54 = arith.addf %44, %53 : vector<8x512xf32>
    %55 = vector.extract_strided_slice %0 {offsets = [0, 5], sizes = [8, 1], strides = [1, 1]} : vector<8x16xi32> to vector<8x1xi32>
    %56 = vector.extract_strided_slice %1 {offsets = [0, 5], sizes = [8, 1], strides = [1, 1]} : vector<8x16xf32> to vector<8x1xf32>
    %57 = vector.broadcast %2 : vector<1x512xi32> to vector<8x512xi32>
    %58 = vector.broadcast %55 : vector<8x1xi32> to vector<8x512xi32>
    %59 = arith.cmpi eq, %57, %58 : vector<8x512xi32>
    %cst_10 = arith.constant 0.000000e+00 : f32
    %60 = vector.shape_cast %56 : vector<8x1xf32> to vector<8x1xf32>
    %61 = vector.broadcast %60 : vector<8x1xf32> to vector<8x512xf32>
    %62 = vector.broadcast %cst_10 : f32 to vector<8x512xf32>
    %63 = arith.select %59, %61, %62 : vector<8x512xi1>, vector<8x512xf32>
    %64 = arith.addf %54, %63 : vector<8x512xf32>
    %65 = vector.extract_strided_slice %0 {offsets = [0, 6], sizes = [8, 1], strides = [1, 1]} : vector<8x16xi32> to vector<8x1xi32>
    %66 = vector.extract_strided_slice %1 {offsets = [0, 6], sizes = [8, 1], strides = [1, 1]} : vector<8x16xf32> to vector<8x1xf32>
    %67 = vector.broadcast %2 : vector<1x512xi32> to vector<8x512xi32>
    %68 = vector.broadcast %65 : vector<8x1xi32> to vector<8x512xi32>
    %69 = arith.cmpi eq, %67, %68 : vector<8x512xi32>
    %cst_11 = arith.constant 0.000000e+00 : f32
    %70 = vector.shape_cast %66 : vector<8x1xf32> to vector<8x1xf32>
    %71 = vector.broadcast %70 : vector<8x1xf32> to vector<8x512xf32>
    %72 = vector.broadcast %cst_11 : f32 to vector<8x512xf32>
    %73 = arith.select %69, %71, %72 : vector<8x512xi1>, vector<8x512xf32>
    %74 = arith.addf %64, %73 : vector<8x512xf32>
    %75 = vector.extract_strided_slice %0 {offsets = [0, 7], sizes = [8, 1], strides = [1, 1]} : vector<8x16xi32> to vector<8x1xi32>
    %76 = vector.extract_strided_slice %1 {offsets = [0, 7], sizes = [8, 1], strides = [1, 1]} : vector<8x16xf32> to vector<8x1xf32>
    %77 = vector.broadcast %2 : vector<1x512xi32> to vector<8x512xi32>
    %78 = vector.broadcast %75 : vector<8x1xi32> to vector<8x512xi32>
    %79 = arith.cmpi eq, %77, %78 : vector<8x512xi32>
    %cst_12 = arith.constant 0.000000e+00 : f32
    %80 = vector.shape_cast %76 : vector<8x1xf32> to vector<8x1xf32>
    %81 = vector.broadcast %80 : vector<8x1xf32> to vector<8x512xf32>
    %82 = vector.broadcast %cst_12 : f32 to vector<8x512xf32>
    %83 = arith.select %79, %81, %82 : vector<8x512xi1>, vector<8x512xf32>
    %84 = arith.addf %74, %83 : vector<8x512xf32>
    %85 = vector.extract_strided_slice %0 {offsets = [0, 8], sizes = [8, 1], strides = [1, 1]} : vector<8x16xi32> to vector<8x1xi32>
    %86 = vector.extract_strided_slice %1 {offsets = [0, 8], sizes = [8, 1], strides = [1, 1]} : vector<8x16xf32> to vector<8x1xf32>
    %87 = vector.broadcast %2 : vector<1x512xi32> to vector<8x512xi32>
    %88 = vector.broadcast %85 : vector<8x1xi32> to vector<8x512xi32>
    %89 = arith.cmpi eq, %87, %88 : vector<8x512xi32>
    %cst_13 = arith.constant 0.000000e+00 : f32
    %90 = vector.shape_cast %86 : vector<8x1xf32> to vector<8x1xf32>
    %91 = vector.broadcast %90 : vector<8x1xf32> to vector<8x512xf32>
    %92 = vector.broadcast %cst_13 : f32 to vector<8x512xf32>
    %93 = arith.select %89, %91, %92 : vector<8x512xi1>, vector<8x512xf32>
    %94 = arith.addf %84, %93 : vector<8x512xf32>
    %95 = vector.extract_strided_slice %0 {offsets = [0, 9], sizes = [8, 1], strides = [1, 1]} : vector<8x16xi32> to vector<8x1xi32>
    %96 = vector.extract_strided_slice %1 {offsets = [0, 9], sizes = [8, 1], strides = [1, 1]} : vector<8x16xf32> to vector<8x1xf32>
    %97 = vector.broadcast %2 : vector<1x512xi32> to vector<8x512xi32>
    %98 = vector.broadcast %95 : vector<8x1xi32> to vector<8x512xi32>
    %99 = arith.cmpi eq, %97, %98 : vector<8x512xi32>
    %cst_14 = arith.constant 0.000000e+00 : f32
    %100 = vector.shape_cast %96 : vector<8x1xf32> to vector<8x1xf32>
    %101 = vector.broadcast %100 : vector<8x1xf32> to vector<8x512xf32>
    %102 = vector.broadcast %cst_14 : f32 to vector<8x512xf32>
    %103 = arith.select %99, %101, %102 : vector<8x512xi1>, vector<8x512xf32>
    %104 = arith.addf %94, %103 : vector<8x512xf32>
    %105 = vector.extract_strided_slice %0 {offsets = [0, 10], sizes = [8, 1], strides = [1, 1]} : vector<8x16xi32> to vector<8x1xi32>
    %106 = vector.extract_strided_slice %1 {offsets = [0, 10], sizes = [8, 1], strides = [1, 1]} : vector<8x16xf32> to vector<8x1xf32>
    %107 = vector.broadcast %2 : vector<1x512xi32> to vector<8x512xi32>
    %108 = vector.broadcast %105 : vector<8x1xi32> to vector<8x512xi32>
    %109 = arith.cmpi eq, %107, %108 : vector<8x512xi32>
    %cst_15 = arith.constant 0.000000e+00 : f32
    %110 = vector.shape_cast %106 : vector<8x1xf32> to vector<8x1xf32>
    %111 = vector.broadcast %110 : vector<8x1xf32> to vector<8x512xf32>
    %112 = vector.broadcast %cst_15 : f32 to vector<8x512xf32>
    %113 = arith.select %109, %111, %112 : vector<8x512xi1>, vector<8x512xf32>
    %114 = arith.addf %104, %113 : vector<8x512xf32>
    %115 = vector.extract_strided_slice %0 {offsets = [0, 11], sizes = [8, 1], strides = [1, 1]} : vector<8x16xi32> to vector<8x1xi32>
    %116 = vector.extract_strided_slice %1 {offsets = [0, 11], sizes = [8, 1], strides = [1, 1]} : vector<8x16xf32> to vector<8x1xf32>
    %117 = vector.broadcast %2 : vector<1x512xi32> to vector<8x512xi32>
    %118 = vector.broadcast %115 : vector<8x1xi32> to vector<8x512xi32>
    %119 = arith.cmpi eq, %117, %118 : vector<8x512xi32>
    %cst_16 = arith.constant 0.000000e+00 : f32
    %120 = vector.shape_cast %116 : vector<8x1xf32> to vector<8x1xf32>
    %121 = vector.broadcast %120 : vector<8x1xf32> to vector<8x512xf32>
    %122 = vector.broadcast %cst_16 : f32 to vector<8x512xf32>
    %123 = arith.select %119, %121, %122 : vector<8x512xi1>, vector<8x512xf32>
    %124 = arith.addf %114, %123 : vector<8x512xf32>
    %125 = vector.extract_strided_slice %0 {offsets = [0, 12], sizes = [8, 1], strides = [1, 1]} : vector<8x16xi32> to vector<8x1xi32>
    %126 = vector.extract_strided_slice %1 {offsets = [0, 12], sizes = [8, 1], strides = [1, 1]} : vector<8x16xf32> to vector<8x1xf32>
    %127 = vector.broadcast %2 : vector<1x512xi32> to vector<8x512xi32>
    %128 = vector.broadcast %125 : vector<8x1xi32> to vector<8x512xi32>
    %129 = arith.cmpi eq, %127, %128 : vector<8x512xi32>
    %cst_17 = arith.constant 0.000000e+00 : f32
    %130 = vector.shape_cast %126 : vector<8x1xf32> to vector<8x1xf32>
    %131 = vector.broadcast %130 : vector<8x1xf32> to vector<8x512xf32>
    %132 = vector.broadcast %cst_17 : f32 to vector<8x512xf32>
    %133 = arith.select %129, %131, %132 : vector<8x512xi1>, vector<8x512xf32>
    %134 = arith.addf %124, %133 : vector<8x512xf32>
    %135 = vector.extract_strided_slice %0 {offsets = [0, 13], sizes = [8, 1], strides = [1, 1]} : vector<8x16xi32> to vector<8x1xi32>
    %136 = vector.extract_strided_slice %1 {offsets = [0, 13], sizes = [8, 1], strides = [1, 1]} : vector<8x16xf32> to vector<8x1xf32>
    %137 = vector.broadcast %2 : vector<1x512xi32> to vector<8x512xi32>
    %138 = vector.broadcast %135 : vector<8x1xi32> to vector<8x512xi32>
    %139 = arith.cmpi eq, %137, %138 : vector<8x512xi32>
    %cst_18 = arith.constant 0.000000e+00 : f32
    %140 = vector.shape_cast %136 : vector<8x1xf32> to vector<8x1xf32>
    %141 = vector.broadcast %140 : vector<8x1xf32> to vector<8x512xf32>
    %142 = vector.broadcast %cst_18 : f32 to vector<8x512xf32>
    %143 = arith.select %139, %141, %142 : vector<8x512xi1>, vector<8x512xf32>
    %144 = arith.addf %134, %143 : vector<8x512xf32>
    %145 = vector.extract_strided_slice %0 {offsets = [0, 14], sizes = [8, 1], strides = [1, 1]} : vector<8x16xi32> to vector<8x1xi32>
    %146 = vector.extract_strided_slice %1 {offsets = [0, 14], sizes = [8, 1], strides = [1, 1]} : vector<8x16xf32> to vector<8x1xf32>
    %147 = vector.broadcast %2 : vector<1x512xi32> to vector<8x512xi32>
    %148 = vector.broadcast %145 : vector<8x1xi32> to vector<8x512xi32>
    %149 = arith.cmpi eq, %147, %148 : vector<8x512xi32>
    %cst_19 = arith.constant 0.000000e+00 : f32
    %150 = vector.shape_cast %146 : vector<8x1xf32> to vector<8x1xf32>
    %151 = vector.broadcast %150 : vector<8x1xf32> to vector<8x512xf32>
    %152 = vector.broadcast %cst_19 : f32 to vector<8x512xf32>
    %153 = arith.select %149, %151, %152 : vector<8x512xi1>, vector<8x512xf32>
    %154 = arith.addf %144, %153 : vector<8x512xf32>
    %155 = vector.extract_strided_slice %0 {offsets = [0, 15], sizes = [8, 1], strides = [1, 1]} : vector<8x16xi32> to vector<8x1xi32>
    %156 = vector.extract_strided_slice %1 {offsets = [0, 15], sizes = [8, 1], strides = [1, 1]} : vector<8x16xf32> to vector<8x1xf32>
    %157 = vector.broadcast %2 : vector<1x512xi32> to vector<8x512xi32>
    %158 = vector.broadcast %155 : vector<8x1xi32> to vector<8x512xi32>
    %159 = arith.cmpi eq, %157, %158 : vector<8x512xi32>
    %cst_20 = arith.constant 0.000000e+00 : f32
    %160 = vector.shape_cast %156 : vector<8x1xf32> to vector<8x1xf32>
    %161 = vector.broadcast %160 : vector<8x1xf32> to vector<8x512xf32>
    %162 = vector.broadcast %cst_20 : f32 to vector<8x512xf32>
    %163 = arith.select %159, %161, %162 : vector<8x512xi1>, vector<8x512xf32>
    %164 = arith.addf %154, %163 : vector<8x512xf32>
    %165 = arith.truncf %164 : vector<8x512xf32> to vector<8x512xbf16>
    %cst_21 = arith.constant dense<0.000000e+00> : vector<8x128xf32>
    %166 = tpu.matmul %165, %3, %cst_21 {dimension_numbers = #tpu.dot_dimension_numbers<[1], [0], [0], [1], [0, 0, 1, 1], [], []>} : vector<8x512xbf16>, vector<512x128xbf16>, vector<8x128xf32> -> vector<8x128xf32>
    %167 = arith.truncf %166 : vector<8x128xf32> to vector<8x128xbf16>
    %c0_22 = arith.constant 0 : index
    %c0_23 = arith.constant 0 : index
    %168 = vector.load %arg4[%c0_22, %c0_23] : memref<8x128xbf16, #tpu.memory_space<vmem>>, vector<8x128xbf16>
    tpu.vector_store %arg4[%c0_22, %c0_23], %167 {strides = array<i32>} : memref<8x128xbf16, #tpu.memory_space<vmem>>, vector<8x128xbf16>,
    return
  }
  func.func @transform_0(%arg0: i32) -> (i32, i32) {
    %c0_i32 = arith.constant 0 : i32
    %c0_i32_0 = arith.constant 0 : i32
    return %arg0, %c0_i32 : i32, i32
  }
  func.func @transform_1(%arg0: i32) -> (i32, i32) {
    %c0_i32 = arith.constant 0 : i32
    %c0_i32_0 = arith.constant 0 : i32
    return %arg0, %c0_i32 : i32, i32
  }
  func.func @transform_2(%arg0: i32) -> (i32, i32) {
    %c0_i32 = arith.constant 0 : i32
    %c0_i32_0 = arith.constant 0 : i32
    %c0_i32_1 = arith.constant 0 : i32
    return %c0_i32, %c0_i32_0 : i32, i32
  }
  func.func @transform_3(%arg0: i32) -> (i32, i32) {
    %c0_i32 = arith.constant 0 : i32
    %c0_i32_0 = arith.constant 0 : i32
    return %arg0, %c0_i32 : i32, i32
  }
}

module attributes {stable_mosaic.version = 11 : i64} {
  func.func @_resident_kernel(%arg0: i32, %arg1: memref<8x16xi32, #tpu.memory_space<vmem>>, %arg2: memref<8x16xf32, #tpu.memory_space<vmem>>, %arg3: memref<512x128xbf16, #tpu.memory_space<vmem>>, %arg4: memref<8x128xbf16, #tpu.memory_space<vmem>>) attributes {dimension_semantics = [#tpu.dimension_semantics<parallel>], iteration_bounds = array<i64: 1>, scalar_prefetch = 0 : i64, scratch_operands = 0 : i64, tpu.core_type = #tpu.core_type<tc>, window_params = [{transform_indices = @transform_0, window_bounds = array<i64: 8, 16>}, {transform_indices = @transform_1, window_bounds = array<i64: 8, 16>}, {pipeline_mode = #tpu.pipeline_mode<synchronous>, transform_indices = @transform_2, window_bounds = array<i64: 512, 128>}, {transform_indices = @transform_3, window_bounds = array<i64: 8, 128>}]} {
    %c0 = arith.constant 0 : index
    %c0_0 = arith.constant 0 : index
    %0 = vector.load %arg1[%c0, %c0_0] : memref<8x16xi32, #tpu.memory_space<vmem>>, vector<8x16xi32>
    %c0_1 = arith.constant 0 : index
    %c0_2 = arith.constant 0 : index
    %1 = vector.load %arg2[%c0_1, %c0_2] : memref<8x16xf32, #tpu.memory_space<vmem>>, vector<8x16xf32>
    %2 = tpu.iota {dimensions = array<i32: 1>} : vector<1x512xi32>
    %c0_3 = arith.constant 0 : index
    %c0_4 = arith.constant 0 : index
    %3 = vector.load %arg3[%c0_3, %c0_4] : memref<512x128xbf16, #tpu.memory_space<vmem>>, vector<512x128xbf16>
    %cst = arith.constant 0.000000e+00 : f32
    %4 = vector.broadcast %cst : f32 to vector<8x512xf32>
    %5 = vector.extract_strided_slice %0 {offsets = [0, 0], sizes = [8, 1], strides = [1, 1]} : vector<8x16xi32> to vector<8x1xi32>
    %6 = vector.extract_strided_slice %1 {offsets = [0, 0], sizes = [8, 1], strides = [1, 1]} : vector<8x16xf32> to vector<8x1xf32>
    %7 = vector.broadcast %2 : vector<1x512xi32> to vector<8x512xi32>
    %8 = vector.broadcast %5 : vector<8x1xi32> to vector<8x512xi32>
    %9 = arith.cmpi eq, %7, %8 : vector<8x512xi32>
    %cst_5 = arith.constant 0.000000e+00 : f32
    %10 = vector.shape_cast %6 : vector<8x1xf32> to vector<8x1xf32>
    %11 = vector.broadcast %10 : vector<8x1xf32> to vector<8x512xf32>
    %12 = vector.broadcast %cst_5 : f32 to vector<8x512xf32>
    %13 = arith.select %9, %11, %12 : vector<8x512xi1>, vector<8x512xf32>
    %14 = arith.addf %4, %13 : vector<8x512xf32>
    %15 = vector.extract_strided_slice %0 {offsets = [0, 1], sizes = [8, 1], strides = [1, 1]} : vector<8x16xi32> to vector<8x1xi32>
    %16 = vector.extract_strided_slice %1 {offsets = [0, 1], sizes = [8, 1], strides = [1, 1]} : vector<8x16xf32> to vector<8x1xf32>
    %17 = vector.broadcast %2 : vector<1x512xi32> to vector<8x512xi32>
    %18 = vector.broadcast %15 : vector<8x1xi32> to vector<8x512xi32>
    %19 = arith.cmpi eq, %17, %18 : vector<8x512xi32>
    %cst_6 = arith.constant 0.000000e+00 : f32
    %20 = vector.shape_cast %16 : vector<8x1xf32> to vector<8x1xf32>
    %21 = vector.broadcast %20 : vector<8x1xf32> to vector<8x512xf32>
    %22 = vector.broadcast %cst_6 : f32 to vector<8x512xf32>
    %23 = arith.select %19, %21, %22 : vector<8x512xi1>, vector<8x512xf32>
    %24 = arith.addf %14, %23 : vector<8x512xf32>
    %25 = vector.extract_strided_slice %0 {offsets = [0, 2], sizes = [8, 1], strides = [1, 1]} : vector<8x16xi32> to vector<8x1xi32>
    %26 = vector.extract_strided_slice %1 {offsets = [0, 2], sizes = [8, 1], strides = [1, 1]} : vector<8x16xf32> to vector<8x1xf32>
    %27 = vector.broadcast %2 : vector<1x512xi32> to vector<8x512xi32>
    %28 = vector.broadcast %25 : vector<8x1xi32> to vector<8x512xi32>
    %29 = arith.cmpi eq, %27, %28 : vector<8x512xi32>
    %cst_7 = arith.constant 0.000000e+00 : f32
    %30 = vector.shape_cast %26 : vector<8x1xf32> to vector<8x1xf32>
    %31 = vector.broadcast %30 : vector<8x1xf32> to vector<8x512xf32>
    %32 = vector.broadcast %cst_7 : f32 to vector<8x512xf32>
    %33 = arith.select %29, %31, %32 : vector<8x512xi1>, vector<8x512xf32>
    %34 = arith.addf %24, %33 : vector<8x512xf32>
    %35 = vector.extract_strided_slice %0 {offsets = [0, 3], sizes = [8, 1], strides = [1, 1]} : vector<8x16xi32> to vector<8x1xi32>
    %36 = vector.extract_strided_slice %1 {offsets = [0, 3], sizes = [8, 1], strides = [1, 1]} : vector<8x16xf32> to vector<8x1xf32>
    %37 = vector.broadcast %2 : vector<1x512xi32> to vector<8x512xi32>
    %38 = vector.broadcast %35 : vector<8x1xi32> to vector<8x512xi32>
    %39 = arith.cmpi eq, %37, %38 : vector<8x512xi32>
    %cst_8 = arith.constant 0.000000e+00 : f32
    %40 = vector.shape_cast %36 : vector<8x1xf32> to vector<8x1xf32>
    %41 = vector.broadcast %40 : vector<8x1xf32> to vector<8x512xf32>
    %42 = vector.broadcast %cst_8 : f32 to vector<8x512xf32>
    %43 = arith.select %39, %41, %42 : vector<8x512xi1>, vector<8x512xf32>
    %44 = arith.addf %34, %43 : vector<8x512xf32>
    %45 = vector.extract_strided_slice %0 {offsets = [0, 4], sizes = [8, 1], strides = [1, 1]} : vector<8x16xi32> to vector<8x1xi32>
    %46 = vector.extract_strided_slice %1 {offsets = [0, 4], sizes = [8, 1], strides = [1, 1]} : vector<8x16xf32> to vector<8x1xf32>
    %47 = vector.broadcast %2 : vector<1x512xi32> to vector<8x512xi32>
    %48 = vector.broadcast %45 : vector<8x1xi32> to vector<8x512xi32>
    %49 = arith.cmpi eq, %47, %48 : vector<8x512xi32>
    %cst_9 = arith.constant 0.000000e+00 : f32
    %50 = vector.shape_cast %46 : vector<8x1xf32> to vector<8x1xf32>
    %51 = vector.broadcast %50 : vector<8x1xf32> to vector<8x512xf32>
    %52 = vector.broadcast %cst_9 : f32 to vector<8x512xf32>
    %53 = arith.select %49, %51, %52 : vector<8x512xi1>, vector<8x512xf32>
    %54 = arith.addf %44, %53 : vector<8x512xf32>
    %55 = vector.extract_strided_slice %0 {offsets = [0, 5], sizes = [8, 1], strides = [1, 1]} : vector<8x16xi32> to vector<8x1xi32>
    %56 = vector.extract_strided_slice %1 {offsets = [0, 5], sizes = [8, 1], strides = [1, 1]} : vector<8x16xf32> to vector<8x1xf32>
    %57 = vector.broadcast %2 : vector<1x512xi32> to vector<8x512xi32>
    %58 = vector.broadcast %55 : vector<8x1xi32> to vector<8x512xi32>
    %59 = arith.cmpi eq, %57, %58 : vector<8x512xi32>
    %cst_10 = arith.constant 0.000000e+00 : f32
    %60 = vector.shape_cast %56 : vector<8x1xf32> to vector<8x1xf32>
    %61 = vector.broadcast %60 : vector<8x1xf32> to vector<8x512xf32>
    %62 = vector.broadcast %cst_10 : f32 to vector<8x512xf32>
    %63 = arith.select %59, %61, %62 : vector<8x512xi1>, vector<8x512xf32>
    %64 = arith.addf %54, %63 : vector<8x512xf32>
    %65 = vector.extract_strided_slice %0 {offsets = [0, 6], sizes = [8, 1], strides = [1, 1]} : vector<8x16xi32> to vector<8x1xi32>
    %66 = vector.extract_strided_slice %1 {offsets = [0, 6], sizes = [8, 1], strides = [1, 1]} : vector<8x16xf32> to vector<8x1xf32>
    %67 = vector.broadcast %2 : vector<1x512xi32> to vector<8x512xi32>
    %68 = vector.broadcast %65 : vector<8x1xi32> to vector<8x512xi32>
    %69 = arith.cmpi eq, %67, %68 : vector<8x512xi32>
    %cst_11 = arith.constant 0.000000e+00 : f32
    %70 = vector.shape_cast %66 : vector<8x1xf32> to vector<8x1xf32>
    %71 = vector.broadcast %70 : vector<8x1xf32> to vector<8x512xf32>
    %72 = vector.broadcast %cst_11 : f32 to vector<8x512xf32>
    %73 = arith.select %69, %71, %72 : vector<8x512xi1>, vector<8x512xf32>
    %74 = arith.addf %64, %73 : vector<8x512xf32>
    %75 = vector.extract_strided_slice %0 {offsets = [0, 7], sizes = [8, 1], strides = [1, 1]} : vector<8x16xi32> to vector<8x1xi32>
    %76 = vector.extract_strided_slice %1 {offsets = [0, 7], sizes = [8, 1], strides = [1, 1]} : vector<8x16xf32> to vector<8x1xf32>
    %77 = vector.broadcast %2 : vector<1x512xi32> to vector<8x512xi32>
    %78 = vector.broadcast %75 : vector<8x1xi32> to vector<8x512xi32>
    %79 = arith.cmpi eq, %77, %78 : vector<8x512xi32>
    %cst_12 = arith.constant 0.000000e+00 : f32
    %80 = vector.shape_cast %76 : vector<8x1xf32> to vector<8x1xf32>
    %81 = vector.broadcast %80 : vector<8x1xf32> to vector<8x512xf32>
    %82 = vector.broadcast %cst_12 : f32 to vector<8x512xf32>
    %83 = arith.select %79, %81, %82 : vector<8x512xi1>, vector<8x512xf32>
    %84 = arith.addf %74, %83 : vector<8x512xf32>
    %85 = vector.extract_strided_slice %0 {offsets = [0, 8], sizes = [8, 1], strides = [1, 1]} : vector<8x16xi32> to vector<8x1xi32>
    %86 = vector.extract_strided_slice %1 {offsets = [0, 8], sizes = [8, 1], strides = [1, 1]} : vector<8x16xf32> to vector<8x1xf32>
    %87 = vector.broadcast %2 : vector<1x512xi32> to vector<8x512xi32>
    %88 = vector.broadcast %85 : vector<8x1xi32> to vector<8x512xi32>
    %89 = arith.cmpi eq, %87, %88 : vector<8x512xi32>
    %cst_13 = arith.constant 0.000000e+00 : f32
    %90 = vector.shape_cast %86 : vector<8x1xf32> to vector<8x1xf32>
    %91 = vector.broadcast %90 : vector<8x1xf32> to vector<8x512xf32>
    %92 = vector.broadcast %cst_13 : f32 to vector<8x512xf32>
    %93 = arith.select %89, %91, %92 : vector<8x512xi1>, vector<8x512xf32>
    %94 = arith.addf %84, %93 : vector<8x512xf32>
    %95 = vector.extract_strided_slice %0 {offsets = [0, 9], sizes = [8, 1], strides = [1, 1]} : vector<8x16xi32> to vector<8x1xi32>
    %96 = vector.extract_strided_slice %1 {offsets = [0, 9], sizes = [8, 1], strides = [1, 1]} : vector<8x16xf32> to vector<8x1xf32>
    %97 = vector.broadcast %2 : vector<1x512xi32> to vector<8x512xi32>
    %98 = vector.broadcast %95 : vector<8x1xi32> to vector<8x512xi32>
    %99 = arith.cmpi eq, %97, %98 : vector<8x512xi32>
    %cst_14 = arith.constant 0.000000e+00 : f32
    %100 = vector.shape_cast %96 : vector<8x1xf32> to vector<8x1xf32>
    %101 = vector.broadcast %100 : vector<8x1xf32> to vector<8x512xf32>
    %102 = vector.broadcast %cst_14 : f32 to vector<8x512xf32>
    %103 = arith.select %99, %101, %102 : vector<8x512xi1>, vector<8x512xf32>
    %104 = arith.addf %94, %103 : vector<8x512xf32>
    %105 = vector.extract_strided_slice %0 {offsets = [0, 10], sizes = [8, 1], strides = [1, 1]} : vector<8x16xi32> to vector<8x1xi32>
    %106 = vector.extract_strided_slice %1 {offsets = [0, 10], sizes = [8, 1], strides = [1, 1]} : vector<8x16xf32> to vector<8x1xf32>
    %107 = vector.broadcast %2 : vector<1x512xi32> to vector<8x512xi32>
    %108 = vector.broadcast %105 : vector<8x1xi32> to vector<8x512xi32>
    %109 = arith.cmpi eq, %107, %108 : vector<8x512xi32>
    %cst_15 = arith.constant 0.000000e+00 : f32
    %110 = vector.shape_cast %106 : vector<8x1xf32> to vector<8x1xf32>
    %111 = vector.broadcast %110 : vector<8x1xf32> to vector<8x512xf32>
    %112 = vector.broadcast %cst_15 : f32 to vector<8x512xf32>
    %113 = arith.select %109, %111, %112 : vector<8x512xi1>, vector<8x512xf32>
    %114 = arith.addf %104, %113 : vector<8x512xf32>
    %115 = vector.extract_strided_slice %0 {offsets = [0, 11], sizes = [8, 1], strides = [1, 1]} : vector<8x16xi32> to vector<8x1xi32>
    %116 = vector.extract_strided_slice %1 {offsets = [0, 11], sizes = [8, 1], strides = [1, 1]} : vector<8x16xf32> to vector<8x1xf32>
    %117 = vector.broadcast %2 : vector<1x512xi32> to vector<8x512xi32>
    %118 = vector.broadcast %115 : vector<8x1xi32> to vector<8x512xi32>
    %119 = arith.cmpi eq, %117, %118 : vector<8x512xi32>
    %cst_16 = arith.constant 0.000000e+00 : f32
    %120 = vector.shape_cast %116 : vector<8x1xf32> to vector<8x1xf32>
    %121 = vector.broadcast %120 : vector<8x1xf32> to vector<8x512xf32>
    %122 = vector.broadcast %cst_16 : f32 to vector<8x512xf32>
    %123 = arith.select %119, %121, %122 : vector<8x512xi1>, vector<8x512xf32>
    %124 = arith.addf %114, %123 : vector<8x512xf32>
    %125 = vector.extract_strided_slice %0 {offsets = [0, 12], sizes = [8, 1], strides = [1, 1]} : vector<8x16xi32> to vector<8x1xi32>
    %126 = vector.extract_strided_slice %1 {offsets = [0, 12], sizes = [8, 1], strides = [1, 1]} : vector<8x16xf32> to vector<8x1xf32>
    %127 = vector.broadcast %2 : vector<1x512xi32> to vector<8x512xi32>
    %128 = vector.broadcast %125 : vector<8x1xi32> to vector<8x512xi32>
    %129 = arith.cmpi eq, %127, %128 : vector<8x512xi32>
    %cst_17 = arith.constant 0.000000e+00 : f32
    %130 = vector.shape_cast %126 : vector<8x1xf32> to vector<8x1xf32>
    %131 = vector.broadcast %130 : vector<8x1xf32> to vector<8x512xf32>
    %132 = vector.broadcast %cst_17 : f32 to vector<8x512xf32>
    %133 = arith.select %129, %131, %132 : vector<8x512xi1>, vector<8x512xf32>
    %134 = arith.addf %124, %133 : vector<8x512xf32>
    %135 = vector.extract_strided_slice %0 {offsets = [0, 13], sizes = [8, 1], strides = [1, 1]} : vector<8x16xi32> to vector<8x1xi32>
    %136 = vector.extract_strided_slice %1 {offsets = [0, 13], sizes = [8, 1], strides = [1, 1]} : vector<8x16xf32> to vector<8x1xf32>
    %137 = vector.broadcast %2 : vector<1x512xi32> to vector<8x512xi32>
    %138 = vector.broadcast %135 : vector<8x1xi32> to vector<8x512xi32>
    %139 = arith.cmpi eq, %137, %138 : vector<8x512xi32>
    %cst_18 = arith.constant 0.000000e+00 : f32
    %140 = vector.shape_cast %136 : vector<8x1xf32> to vector<8x1xf32>
    %141 = vector.broadcast %140 : vector<8x1xf32> to vector<8x512xf32>
    %142 = vector.broadcast %cst_18 : f32 to vector<8x512xf32>
    %143 = arith.select %139, %141, %142 : vector<8x512xi1>, vector<8x512xf32>
    %144 = arith.addf %134, %143 : vector<8x512xf32>
    %145 = vector.extract_strided_slice %0 {offsets = [0, 14], sizes = [8, 1], strides = [1, 1]} : vector<8x16xi32> to vector<8x1xi32>
    %146 = vector.extract_strided_slice %1 {offsets = [0, 14], sizes = [8, 1], strides = [1, 1]} : vector<8x16xf32> to vector<8x1xf32>
    %147 = vector.broadcast %2 : vector<1x512xi32> to vector<8x512xi32>
    %148 = vector.broadcast %145 : vector<8x1xi32> to vector<8x512xi32>
    %149 = arith.cmpi eq, %147, %148 : vector<8x512xi32>
    %cst_19 = arith.constant 0.000000e+00 : f32
    %150 = vector.shape_cast %146 : vector<8x1xf32> to vector<8x1xf32>
    %151 = vector.broadcast %150 : vector<8x1xf32> to vector<8x512xf32>
    %152 = vector.broadcast %cst_19 : f32 to vector<8x512xf32>
    %153 = arith.select %149, %151, %152 : vector<8x512xi1>, vector<8x512xf32>
    %154 = arith.addf %144, %153 : vector<8x512xf32>
    %155 = vector.extract_strided_slice %0 {offsets = [0, 15], sizes = [8, 1], strides = [1, 1]} : vector<8x16xi32> to vector<8x1xi32>
    %156 = vector.extract_strided_slice %1 {offsets = [0, 15], sizes = [8, 1], strides = [1, 1]} : vector<8x16xf32> to vector<8x1xf32>
    %157 = vector.broadcast %2 : vector<1x512xi32> to vector<8x512xi32>
    %158 = vector.broadcast %155 : vector<8x1xi32> to vector<8x512xi32>
    %159 = arith.cmpi eq, %157, %158 : vector<8x512xi32>
    %cst_20 = arith.constant 0.000000e+00 : f32
    %160 = vector.shape_cast %156 : vector<8x1xf32> to vector<8x1xf32>
    %161 = vector.broadcast %160 : vector<8x1xf32> to vector<8x512xf32>
    %162 = vector.broadcast %cst_20 : f32 to vector<8x512xf32>
    %163 = arith.select %159, %161, %162 : vector<8x512xi1>, vector<8x512xf32>
    %164 = arith.addf %154, %163 : vector<8x512xf32>
    %165 = arith.truncf %164 : vector<8x512xf32> to vector<8x512xbf16>
    %cst_21 = arith.constant dense<0.000000e+00> : vector<8x128xf32>
    %166 = tpu.matmul %165, %3, %cst_21 {dimension_numbers = #tpu.dot_dimension_numbers<[1], [0], [0], [1], [0, 0, 1, 1], [], []>} : vector<8x512xbf16>, vector<512x128xbf16>, vector<8x128xf32> -> vector<8x128xf32>
    %167 = arith.truncf %166 : vector<8x128xf32> to vector<8x128xbf16>
    %c0_22 = arith.constant 0 : index
    %c0_23 = arith.constant 0 : index
    %168 = vector.load %arg4[%c0_22, %c0_23] : memref<8x128xbf16, #tpu.memory_space<vmem>>, vector<8x128xbf16>
    tpu.vector_store %arg4[%c0_22, %c0_23], %167 {strides = array<i32>} : memref<8x128xbf16, #tpu.memory_space<vmem>>, vector<8x128xbf16>,
    return
  }
  func.func @transform_0(%arg0: i32) -> (i32, i32) {
    %c0_i32 = arith.constant 0 : i32
    %c0_i32_0 = arith.constant 0 : i32
    return %arg0, %c0_i32 : i32, i32
  }
  func.func @transform_1(%arg0: i32) -> (i32, i32) {
    %c0_i32 = arith.constant 0 : i32
    %c0_i32_0 = arith.constant 0 : i32
    return %arg0, %c0_i32 : i32, i32
  }
  func.func @transform_2(%arg0: i32) -> (i32, i32) {
    %c0_i32 = arith.constant 0 : i32
    %c0_i32_0 = arith.constant 0 : i32
    %c0_i32_1 = arith.constant 0 : i32
    return %c0_i32, %c0_i32_0 : i32, i32
  }
  func.func @transform_3(%arg0: i32) -> (i32, i32) {
    %c0_i32 = arith.constant 0 : i32
    %c0_i32_0 = arith.constant 0 : i32
    return %arg0, %c0_i32 : i32, i32
  }
}

</mosaic_0001>

<bundles_post_ra>
// kernel: tpu_custom_call.1
= control target key start
LH: loop header
LB: loop body
LE: loop exit
PB: predicated region body
PF: predicated region fallthrough
CT: control target
= control target key end

     0   :  { %8 = vsyncpa [#allocation3], 0  ;;  %s1272_s0 = inlined_call_operand.hbm [shape: s32[8,16], index: 0, kind: input, shape index: {}]   ;;  %s1273_s1 = inlined_call_operand.hbm [shape: f32[8,16], index: 1, kind: input, shape index: {}]   ;;  %s1274_s2 = inlined_call_operand.hbm [shape: bf16[512,128], index: 2, kind: input, shape index: {}]   ;;  %s1275_s3 = inlined_call_operand.hbm [shape: bf16[8,128], index: 3, kind: output, shape index: {}]  }
   0x1   :  { %9 = vsyncpa [#allocation6], 0 }
   0x2   :  { %10 = vsyncpa [#allocation4], 0  ;;  %s975_s12 = smov [#allocation5]   ;;  %s976_s14 = smov [#allocation2]  }
   0x3   :  { %s27_s13 = sshll.u32 %s975_s12, 4  ;;  %s17_s15 = sshll.u32 %s976_s14, 4  ;;  %s28_s13 = int_to_ptr.vmem [resolvable:$true] %s27_s13  ;;  %s18_s15 = int_to_ptr.vmem [resolvable:$true] %s17_s15 }
   0x4   :  { %s881_s18 = scalar_lea.hbm %s1273_s1, 128 }
   0x5   :  { %p882_p0 = scmp.ne.s32.totalorder %s1273_s1, %s881_s18  ;;  %p885_p1 = scmp.lt.u32.totalorder %s881_s18, %s1273_s1 }
   0x7   :  { %p887_p2 = pnand %p885_p1, %p882_p0 }
   0x9   :  { %890 = shalt.err (!%p887_p2)
}
   0xa   :  { %s891_s23 = scalar_lea.vmem %s28_s13, 128  ;;  %p896_p4 = scmp.lt.s32.totalorder %s28_s13, %s28_s13 }
   0xb   :  { %p892_p3 = scmp.ne.s32.totalorder %s28_s13, %s891_s23  ;;  %p897_p5 = scmp.lt.s32.totalorder %s891_s23, %s891_s23 }
   0xd   :  { %p898_p6 = por %p897_p5, %p896_p4 }
   0xf   :  { %p899_p7 = pnand %p898_p6, %p892_p3 }
  0x11   :  { %902 = shalt.err (!%p899_p7)
}
  0x12   :  { %30 = dma.hbm_to_vmem [thread:$0]  %s1273_s1, 128, %s28_s13, [#allocation6]  }
  0x13   :  { %s903_s28 = scalar_lea.hbm %s1272_s0, 128 }
  0x14   :  { %p904_p8 = scmp.ne.s32.totalorder %s1272_s0, %s903_s28  ;;  %p907_p9 = scmp.lt.u32.totalorder %s903_s28, %s1272_s0 }
  0x16   :  { %p909_p10 = pnand %p907_p9, %p904_p8 }
  0x18   :  { %912 = shalt.err (!%p909_p10)
}
  0x19   :  { %s913_s6 = scalar_lea.vmem %s18_s15, 128  ;;  %p918_p12 = scmp.lt.s32.totalorder %s18_s15, %s18_s15 }
  0x1a   :  { %p914_p11 = scmp.ne.s32.totalorder %s18_s15, %s913_s6  ;;  %p919_p13 = scmp.lt.s32.totalorder %s913_s6, %s913_s6 }
  0x1c   :  { %p920_p0 = por %p919_p13, %p918_p12 }
  0x1e   :  { %p921_p1 = pnand %p920_p0, %p914_p11 }
  0x20   :  { %924 = shalt.err (!%p921_p1)
}
  0x21   :  { %20 = dma.hbm_to_vmem [thread:$0]  %s1272_s0, 128, %s18_s15, [#allocation3]  }
  0x22   :  { %s977_s8 = smov [#allocation7]   ;;  %s925_s12 = scalar_lea.hbm %s1274_s2, 4096 }
  0x23   :  { %s36_s9 = sshll.u32 %s977_s8, 4  ;;  %p926_p2 = scmp.ne.s32.totalorder %s1274_s2, %s925_s12  ;;  %s37_s9 = int_to_ptr.vmem [resolvable:$true] %s36_s9 }
  0x24   :  { %p929_p3 = scmp.lt.u32.totalorder %s925_s12, %s1274_s2 }
  0x26   :  { %p931_p4 = pnand %p929_p3, %p926_p2 }
  0x28   :  { %934 = shalt.err (!%p931_p4)
}
  0x29   :  { %s935_s18 = scalar_lea.vmem %s37_s9, 4096  ;;  %p940_p6 = scmp.lt.s32.totalorder %s37_s9, %s37_s9 }
  0x2a   :  { %p936_p5 = scmp.ne.s32.totalorder %s37_s9, %s935_s18  ;;  %p941_p7 = scmp.lt.s32.totalorder %s935_s18, %s935_s18 }
  0x2c   :  { %p942_p8 = por %p941_p7, %p940_p6 }
  0x2e   :  { %p943_p9 = pnand %p942_p8, %p936_p5 }
  0x30   :  { %946 = shalt.err (!%p943_p9)
}
  0x31   :  { %s978_s0 = smov 64   ;;  %s979_s15 = smov 4  }
  0x32   :  { %42 = dma.hbm_to_vmem [thread:$0]  %s1274_s2, 4096, %s37_s9, [#allocation6], %s978_s0, %s978_s0, %s979_s15  }
  0x33   :  { %969 = dma.done.wait [#allocation3], 128  }
  0x34   :  { %970 = vsyncadd [#allocation3], 4294967168 }
  0x35   :  { %971 = dma.done.wait [#allocation6], 4224  }
  0x36   :  { %972 = vsyncadd [#allocation6], 4294963072  ;;  %v980_v0 = vmov 0   ;;  %v1053_v1 = vld [vmem:[#allocation5] sm:$0xff]  ;;  %v1055_v2 = vld [vmem:[#allocation2] sm:$0xff]  ;;  %v981_v3 = vmov 1   ;;  %v55_v58 = vlaneseq }
  0x37   :  { %823 = vset.pattern.permute.xlu1 %v980_v0  ;;  %821 = vset.pattern.permute.xlu0 %v980_v0  ;;  %v982_v4 = vmov 2   ;;  %v983_v5 = vmov 3   ;;  %v984_v6 = vmov 4   ;;  %v985_v7 = vmov 5   ;;  %v849_v17 = vld [vmem:[#allocation7 + $0x40] sm:$0xff]   ;;  %v853_v22 = vld [vmem:[#allocation7 + $0x48] sm:$0xff]  }
  0x38   :  { %133 = vperm.xlu1 %823, %v1053_v1   ;;  %125 = vperm.xlu0 %821, %v1055_v2   ;;  %v986_v8 = vmov 7   ;;  %v987_v9 = vmov 8   ;;  %v988_v10 = vmov 6   ;;  %v989_v11 = vmov 10   ;;  %v850_v18 = vld [vmem:[#allocation7 + $0xc0] sm:$0xff]   ;;  %v854_v23 = vld [vmem:[#allocation7 + $0xc8] sm:$0xff]  }
  0x39   :  { %v990_v12 = vmov 11   ;;  %v991_v13 = vmov 13   ;;  %v992_v14 = vmov 14   ;;  %v993_v15 = vmov 9   ;;  %v851_v19 = vld [vmem:[#allocation7] sm:$0xff]   ;;  %755 = vmatprep.subr.bf16.mxu0 %v849_v17  ;;  %777 = vmatprep.subr.bf16.mxu1 %v850_v18  ;;  %v855_v24 = vld [vmem:[#allocation7 + $0x8] sm:$0xff]  }
  0x3a   :  { %v994_v16 = vmov 15   ;;  %v852_v20 = vld [vmem:[#allocation7 + $0x80] sm:$0xff]   ;;  %756 = vmatpush3.bf16.msra.mxu0 %v851_v19  ;;  %v995_v21 = vmov 12   ;;  %v856_v25 = vld [vmem:[#allocation7 + $0x88] sm:$0xff]   ;;  %v857_v26 = vld [vmem:[#allocation7 + $0x50] sm:$0xff]   ;;  %v1099_v61 = vand.u32 127, %v55_v58 }
  0x3b   :  { %778 = vmatpush3.bf16.msra.mxu1 %v852_v20  ;;  %757 = vmatprep.subr.bf16.mxu0 %v853_v22  ;;  %v858_v27 = vld [vmem:[#allocation7 + $0xd0] sm:$0xff]   ;;  %v861_v30 = vld [vmem:[#allocation7 + $0x58] sm:$0xff]   ;;  %v865_v34 = vld [vmem:[#allocation7 + $0x60] sm:$0xff]   ;;  %s996_s2 = smov [#allocation8]  }
  0x3c   :  { %824 = vset.pattern.permute.xlu1 %v981_v3  ;;  %822 = vset.pattern.permute.xlu0 %v981_v3  ;;  %v859_v28 = vld [vmem:[#allocation7 + $0x10] sm:$0xff]   ;;  %v862_v31 = vld [vmem:[#allocation7 + $0xd8] sm:$0xff]   ;;  %v866_v35 = vld [vmem:[#allocation7 + $0xe0] sm:$0xff]   ;;  %v1104_v63 = vadd.s32 128, %v1099_v61  ;;  %v1107_v0 = vadd.s32 256, %v1099_v61  ;;  %s713_s21 = sshll.u32 %s996_s2, 4  ;;  %s714_s21 = int_to_ptr.vmem [resolvable:$true] %s713_s21 }
  0x3d   :  { %152 = vperm.xlu1 %824, %v1053_v1   ;;  %145 = vperm.xlu0 %822, %v1055_v2   ;;  %v860_v29 = vld [vmem:[#allocation7 + $0x90] sm:$0xff]   ;;  %v863_v32 = vld [vmem:[#allocation7 + $0x18] sm:$0xff]   ;;  %v867_v36 = vld [vmem:[#allocation7 + $0x20] sm:$0xff]   ;;  %s947_s22 = scalar_lea.vmem %s714_s21, 64  ;;  %p952_p11 = scmp.lt.s32.totalorder %s714_s21, %s714_s21 }
  0x3e   :  { %779 = vmatprep.subr.bf16.mxu1 %v854_v23  ;;  %758 = vmatpush3.bf16.msra.mxu0 %v855_v24  ;;  %v864_v33 = vld [vmem:[#allocation7 + $0x98] sm:$0xff]   ;;  %v868_v37 = vld [vmem:[#allocation7 + $0xa0] sm:$0xff]   ;;  %v869_v38 = vld [vmem:[#allocation7 + $0x68] sm:$0xff]   ;;  %p948_p10 = scmp.ne.s32.totalorder %s714_s21, %s947_s22  ;;  %p953_p12 = scmp.lt.s32.totalorder %s947_s22, %s947_s22 }
  0x3f   :  { %780 = vmatpush3.bf16.msra.mxu1 %v856_v25  ;;  %759 = vmatprep.subr.bf16.mxu0 %v857_v26  ;;  %v870_v39 = vld [vmem:[#allocation7 + $0xe8] sm:$0xff]   ;;  %v873_v42 = vld [vmem:[#allocation7 + $0x70] sm:$0xff]   ;;  %v877_v46 = vld [vmem:[#allocation7 + $0x78] sm:$0xff]  }
  0x40   :  { %781 = vmatprep.subr.bf16.mxu1 %v858_v27  ;;  %v871_v40 = vld [vmem:[#allocation7 + $0x28] sm:$0xff]   ;;  %v874_v43 = vld [vmem:[#allocation7 + $0xf0] sm:$0xff]   ;;  %v878_v47 = vld [vmem:[#allocation7 + $0xf8] sm:$0xff]   ;;  %p954_p13 = por %p953_p12, %p952_p11 }
  0x41   :  { %825 = vset.pattern.permute.xlu1 %v982_v4  ;;  %826 = vset.pattern.permute.xlu0 %v982_v4  ;;  %v872_v41 = vld [vmem:[#allocation7 + $0xa8] sm:$0xff]   ;;  %v875_v44 = vld [vmem:[#allocation7 + $0x30] sm:$0xff]   ;;  %v879_v48 = vld [vmem:[#allocation7 + $0x38] sm:$0xff]  }
  0x42   :  { %164 = vperm.xlu1 %825, %v1055_v2   ;;  %171 = vperm.xlu0 %826, %v1053_v1   ;;  %v876_v45 = vld [vmem:[#allocation7 + $0xb0] sm:$0xff]   ;;  %v880_v49 = vld [vmem:[#allocation7 + $0xb8] sm:$0xff]   ;;  %p955_p0 = pnand %p954_p13, %p948_p10 }
  0x43   :  { %760 = vmatpush3.bf16.msra.mxu0 %v859_v28  ;;  %782 = vmatpush3.bf16.msra.mxu1 %v860_v29 }
  0x44   :  { %761 = vmatprep.subr.bf16.mxu0 %v861_v30  ;;  %783 = vmatprep.subr.bf16.mxu1 %v862_v31 }
  0x46   :  { %827 = vset.pattern.permute.xlu1 %v983_v5  ;;  %828 = vset.pattern.permute.xlu0 %v984_v6 }
  0x47   :  { %183 = vperm.xlu1 %827, %v1055_v2   ;;  %202 = vperm.xlu0 %828, %v1055_v2  }
  0x48   :  { %762 = vmatpush3.bf16.msra.mxu0 %v863_v32  ;;  %784 = vmatpush3.bf16.msra.mxu1 %v864_v33 }
  0x49   :  { %763 = vmatprep.subr.bf16.mxu0 %v865_v34  ;;  %785 = vmatprep.subr.bf16.mxu1 %v866_v35 }
  0x4b   :  { %190 = vperm.xlu1 %827, %v1053_v1   ;;  %831 = vset.pattern.permute.xlu0 %v985_v7 }
  0x4c   :  { %228 = vperm.xlu0 %831, %v1053_v1   ;;  %764 = vmatpush3.bf16.msra.mxu0 %v867_v36 }
  0x4d   :  { %786 = vmatpush3.bf16.msra.mxu1 %v868_v37  ;;  %765 = vmatprep.subr.bf16.mxu0 %v869_v38 }
  0x4e   :  { %787 = vmatprep.subr.bf16.mxu1 %v870_v39 }
  0x4f   :  { %829 = vset.pattern.permute.xlu1 %v984_v6 }
  0x50   :  { %209 = vperm.xlu1 %829, %v1053_v1   ;;  %833 = vset.pattern.permute.xlu0 %v986_v8 }
  0x51   :  { %259 = vperm.xlu0 %833, %v1055_v2   ;;  %766 = vmatpush3.bf16.msra.mxu0 %v871_v40 }
  0x52   :  { %788 = vmatpush3.bf16.msra.mxu1 %v872_v41  ;;  %767 = vmatprep.subr.bf16.mxu0 %v873_v42 }
  0x53   :  { %789 = vmatprep.subr.bf16.mxu1 %v874_v43 }
  0x54   :  { %830 = vset.pattern.permute.xlu1 %v985_v7 }
  0x55   :  { %221 = vperm.xlu1 %830, %v1055_v2   ;;  %836 = vset.pattern.permute.xlu0 %v987_v9 }
  0x56   :  { %285 = vperm.xlu0 %836, %v1053_v1   ;;  %768 = vmatpush3.bf16.msra.mxu0 %v875_v44 }
  0x57   :  { %790 = vmatpush3.bf16.msra.mxu1 %v876_v45  ;;  %769 = vmatprep.subr.bf16.mxu0 %v877_v46 }
  0x58   :  { %791 = vmatprep.subr.bf16.mxu1 %v878_v47 }
  0x59   :  { %832 = vset.pattern.permute.xlu1 %v988_v10 }
  0x5a   :  { %240 = vperm.xlu1 %832, %v1055_v2   ;;  %838 = vset.pattern.permute.xlu0 %v989_v11 }
  0x5b   :  { %316 = vperm.xlu0 %838, %v1055_v2   ;;  %770 = vmatpush3.bf16.msra.mxu0 %v879_v48 }
  0x5c   :  { %792 = vmatpush3.bf16.msra.mxu1 %v880_v49 }
  0x5e   :  { %247 = vperm.xlu1 %832, %v1053_v1  }
  0x5f   :  { %841 = vset.pattern.permute.xlu0 %v990_v12 }
  0x60   :  { %342 = vperm.xlu0 %841, %v1053_v1  }
  0x62   :  { %834 = vset.pattern.permute.xlu1 %v986_v8 }
  0x63   :  { %266 = vperm.xlu1 %834, %v1053_v1  }
  0x64   :  { %843 = vset.pattern.permute.xlu0 %v991_v13 }
  0x65   :  { %373 = vperm.xlu0 %843, %v1055_v2  }
  0x67   :  { %835 = vset.pattern.permute.xlu1 %v987_v9 }
  0x68   :  { %278 = vperm.xlu1 %835, %v1055_v2  }
  0x69   :  { %846 = vset.pattern.permute.xlu0 %v992_v14 }
  0x6a   :  { %399 = vperm.xlu0 %846, %v1053_v1  }
  0x6c   :  { %837 = vset.pattern.permute.xlu1 %v993_v15 }
  0x6d   :  { %297 = vperm.xlu1 %837, %v1055_v2  }
  0x6e   :  { %848 = vset.pattern.permute.xlu0 %v994_v16 }
  0x71   :  { %304 = vperm.xlu1 %837, %v1053_v1  }
  0x75   :  { %839 = vset.pattern.permute.xlu1 %v989_v11 }
  0x76   :  { %323 = vperm.xlu1 %839, %v1053_v1  }
  0x7a   :  { %840 = vset.pattern.permute.xlu1 %v990_v12 }
  0x7b   :  { %335 = vperm.xlu1 %840, %v1055_v2  }
  0x7f   :  { %842 = vset.pattern.permute.xlu1 %v995_v21 }
  0x80   :  { %354 = vperm.xlu1 %842, %v1055_v2  }
  0x84   :  { %361 = vperm.xlu1 %842, %v1053_v1  }
  0x88   :  { %844 = vset.pattern.permute.xlu1 %v991_v13 }
  0x89   :  { %380 = vperm.xlu1 %844, %v1053_v1  }
  0x8d   :  { %845 = vset.pattern.permute.xlu1 %v992_v14 }
  0x8e   :  { %392 = vperm.xlu1 %845, %v1055_v2  }
  0x92   :  { %847 = vset.pattern.permute.xlu1 %v994_v16 }
  0x93   :  { %411 = vperm.xlu1 %847, %v1055_v2  }
  0x97   :  { %418 = vperm.xlu1 %847, %v1053_v1   ;;  %v1110_v1 = vadd.s32 384, %v1099_v61 }
  0xb7   :  { %v134_v50 = vpop.permute.xlu1 %133  ;;  %v126_v60 = vpop.permute.xlu0 %125 }
  0xb8   :  { %vm127_vm4 = vcmp.eq.s32.totalorder %v1099_v61, %v126_v60  ;;  %vm128_vm5 = vcmp.eq.s32.totalorder %v1104_v63, %v126_v60  ;;  %vm129_vm6 = vcmp.eq.s32.totalorder %v1107_v0, %v126_v60  ;;  %vm130_vm7 = vcmp.eq.s32.totalorder %v1110_v1, %v126_v60 }
  0xb9   :  { %v136_v9 = vsel %vm127_vm4, %v134_v50, 0.0  ;;  %v137_v10 = vsel %vm128_vm5, %v134_v50, 0.0  ;;  %v138_v11 = vsel %vm129_vm6, %v134_v50, 0.0  ;;  %v139_v12 = vsel %vm130_vm7, %v134_v50, 0.0 }
  0xbc   :  { %v153_v51 = vpop.permute.xlu1 %152  ;;  %v146_v2 = vpop.permute.xlu0 %145 }
  0xbd   :  { %vm147_vm0 = vcmp.eq.s32.totalorder %v1099_v61, %v146_v2  ;;  %vm148_vm1 = vcmp.eq.s32.totalorder %v1104_v63, %v146_v2  ;;  %vm149_vm2 = vcmp.eq.s32.totalorder %v1107_v0, %v146_v2  ;;  %vm150_vm3 = vcmp.eq.s32.totalorder %v1110_v1, %v146_v2 }
  0xbe   :  { %v155_v5 = vsel %vm147_vm0, %v153_v51, 0.0  ;;  %v156_v6 = vsel %vm148_vm1, %v153_v51, 0.0  ;;  %v157_v7 = vsel %vm149_vm2, %v153_v51, 0.0  ;;  %v158_v8 = vsel %vm150_vm3, %v153_v51, 0.0 }
  0xbf   :  { %v159_v18 = vadd.f32 %v155_v5, %v136_v9  ;;  %v160_v19 = vadd.f32 %v156_v6, %v137_v10  ;;  %v161_v20 = vadd.f32 %v157_v7, %v138_v11  ;;  %v162_v21 = vadd.f32 %v158_v8, %v139_v12 }
  0xc1   :  { %v165_v52 = vpop.permute.xlu1 %164  ;;  %v172_v4 = vpop.permute.xlu0 %171 }
  0xc2   :  { %vm166_vm8 = vcmp.eq.s32.totalorder %v1099_v61, %v165_v52  ;;  %vm167_vm9 = vcmp.eq.s32.totalorder %v1104_v63, %v165_v52  ;;  %vm168_vm10 = vcmp.eq.s32.totalorder %v1107_v0, %v165_v52  ;;  %vm169_vm11 = vcmp.eq.s32.totalorder %v1110_v1, %v165_v52 }
  0xc3   :  { %v174_v14 = vsel %vm166_vm8, %v172_v4, 0.0  ;;  %v175_v15 = vsel %vm167_vm9, %v172_v4, 0.0  ;;  %v176_v16 = vsel %vm168_vm10, %v172_v4, 0.0  ;;  %v177_v17 = vsel %vm169_vm11, %v172_v4, 0.0 }
  0xc4   :  { %v178_v23 = vadd.f32 %v174_v14, %v159_v18  ;;  %v179_v24 = vadd.f32 %v175_v15, %v160_v19  ;;  %v180_v25 = vadd.f32 %v176_v16, %v161_v20  ;;  %v181_v26 = vadd.f32 %v177_v17, %v162_v21 }
  0xc6   :  { %v1089_v53 = vpop.permute.xlu1 %183  ;;  %v203_v22 = vpop.permute.xlu0 %202 }
  0xc7   :  { %vm185_vm12 = vcmp.eq.s32.totalorder %v1099_v61, %v1089_v53  ;;  %vm186_vm13 = vcmp.eq.s32.totalorder %v1104_v63, %v1089_v53  ;;  %vm187_vm14 = vcmp.eq.s32.totalorder %v1107_v0, %v1089_v53  ;;  %vm188_vm15 = vcmp.eq.s32.totalorder %v1110_v1, %v1089_v53 }
  0xc8   :  { %vm204_vm0 = vcmp.eq.s32.totalorder %v1099_v61, %v203_v22  ;;  %vm205_vm1 = vcmp.eq.s32.totalorder %v1104_v63, %v203_v22  ;;  %vm206_vm2 = vcmp.eq.s32.totalorder %v1107_v0, %v203_v22  ;;  %vm207_vm3 = vcmp.eq.s32.totalorder %v1110_v1, %v203_v22 }
  0xca   :  { %v191_v54 = vpop.permute.xlu1 %190 }
  0xcb   :  { %v229_v28 = vpop.permute.xlu0 %228  ;;  %v193_v29 = vsel %vm185_vm12, %v191_v54, 0.0  ;;  %v194_v30 = vsel %vm186_vm13, %v191_v54, 0.0  ;;  %v195_v31 = vsel %vm187_vm14, %v191_v54, 0.0  ;;  %v196_v32 = vsel %vm188_vm15, %v191_v54, 0.0 }
  0xcc   :  { %v197_v38 = vadd.f32 %v193_v29, %v178_v23  ;;  %v198_v39 = vadd.f32 %v194_v30, %v179_v24  ;;  %v199_v40 = vadd.f32 %v195_v31, %v180_v25  ;;  %v200_v41 = vadd.f32 %v196_v32, %v181_v26 }
  0xcf   :  { %v1091_v55 = vpop.permute.xlu1 %209 }
  0xd0   :  { %v212_v33 = vsel %vm204_vm0, %v1091_v55, 0.0  ;;  %v213_v34 = vsel %vm205_vm1, %v1091_v55, 0.0  ;;  %v214_v35 = vsel %vm206_vm2, %v1091_v55, 0.0  ;;  %v215_v36 = vsel %vm207_vm3, %v1091_v55, 0.0  ;;  %v260_v42 = vpop.permute.xlu0 %259 }
  0xd1   :  { %v216_v47 = vadd.f32 %v212_v33, %v197_v38  ;;  %v217_v48 = vadd.f32 %v213_v34, %v198_v39  ;;  %v218_v49 = vadd.f32 %v214_v35, %v199_v40  ;;  %v219_v50 = vadd.f32 %v215_v36, %v200_v41 }
  0xd2   :  { %vm261_vm8 = vcmp.eq.s32.totalorder %v1099_v61, %v260_v42  ;;  %vm262_vm9 = vcmp.eq.s32.totalorder %v1104_v63, %v260_v42  ;;  %vm263_vm10 = vcmp.eq.s32.totalorder %v1107_v0, %v260_v42  ;;  %vm264_vm11 = vcmp.eq.s32.totalorder %v1110_v1, %v260_v42 }
  0xd4   :  { %v1093_v56 = vpop.permute.xlu1 %221 }
  0xd5   :  { %vm223_vm4 = vcmp.eq.s32.totalorder %v1099_v61, %v1093_v56  ;;  %vm224_vm5 = vcmp.eq.s32.totalorder %v1104_v63, %v1093_v56  ;;  %vm225_vm6 = vcmp.eq.s32.totalorder %v1107_v0, %v1093_v56  ;;  %vm226_vm7 = vcmp.eq.s32.totalorder %v1110_v1, %v1093_v56  ;;  %v286_v56 = vpop.permute.xlu0 %285 }
  0xd6   :  { %v231_v43 = vsel %vm223_vm4, %v229_v28, 0.0  ;;  %v232_v44 = vsel %vm224_vm5, %v229_v28, 0.0  ;;  %v233_v45 = vsel %vm225_vm6, %v229_v28, 0.0  ;;  %v234_v46 = vsel %vm226_vm7, %v229_v28, 0.0 }
  0xd7   :  { %v235_v51 = vadd.f32 %v231_v43, %v216_v47  ;;  %v236_v52 = vadd.f32 %v232_v44, %v217_v48  ;;  %v237_v53 = vadd.f32 %v233_v45, %v218_v49  ;;  %v238_v54 = vadd.f32 %v234_v46, %v219_v50 }
  0xd9   :  { %v1095_v57 = vpop.permute.xlu1 %240 }
  0xda   :  { %vm242_vm12 = vcmp.eq.s32.totalorder %v1099_v61, %v1095_v57  ;;  %vm243_vm13 = vcmp.eq.s32.totalorder %v1104_v63, %v1095_v57  ;;  %vm244_vm14 = vcmp.eq.s32.totalorder %v1107_v0, %v1095_v57  ;;  %vm245_vm15 = vcmp.eq.s32.totalorder %v1110_v1, %v1095_v57  ;;  %v317_v10 = vpop.permute.xlu0 %316 }
  0xdb   :  { %vm318_vm4 = vcmp.eq.s32.totalorder %v1099_v61, %v317_v10  ;;  %vm319_vm5 = vcmp.eq.s32.totalorder %v1104_v63, %v317_v10  ;;  %vm320_vm6 = vcmp.eq.s32.totalorder %v1107_v0, %v317_v10  ;;  %vm321_vm7 = vcmp.eq.s32.totalorder %v1110_v1, %v317_v10 }
  0xdd   :  { %v1097_v59 = vpop.permute.xlu1 %247 }
  0xde   :  { %v250_v58 = vsel %vm242_vm12, %v1097_v59, 0.0  ;;  %v251_v60 = vsel %vm243_vm13, %v1097_v59, 0.0  ;;  %v252_v2 = vsel %vm244_vm14, %v1097_v59, 0.0  ;;  %v253_v4 = vsel %vm245_vm15, %v1097_v59, 0.0 }
  0xdf   :  { %v254_v7 = vadd.f32 %v250_v58, %v235_v51  ;;  %v255_v8 = vadd.f32 %v251_v60, %v236_v52  ;;  %v256_v9 = vadd.f32 %v252_v2, %v237_v53  ;;  %v343_v25 = vpop.permute.xlu0 %342 }
  0xe2   :  { %v1101_v62 = vpop.permute.xlu1 %266 }
  0xe3   :  { %v269_v57 = vsel %vm261_vm8, %v1101_v62, 0.0  ;;  %v270_v59 = vsel %vm262_vm9, %v1101_v62, 0.0  ;;  %v271_v5 = vsel %vm263_vm10, %v1101_v62, 0.0  ;;  %v272_v6 = vsel %vm264_vm11, %v1101_v62, 0.0 }
  0xe4   :  { %v273_v17 = vadd.f32 %v269_v57, %v254_v7  ;;  %v274_v18 = vadd.f32 %v270_v59, %v255_v8  ;;  %v275_v19 = vadd.f32 %v271_v5, %v256_v9  ;;  %v374_v38 = vpop.permute.xlu0 %373 }
  0xe7   :  { %v1112_v3 = vpop.permute.xlu1 %278 }
  0xe8   :  { %vm280_vm0 = vcmp.eq.s32.totalorder %v1099_v61, %v1112_v3  ;;  %vm281_vm1 = vcmp.eq.s32.totalorder %v1104_v63, %v1112_v3  ;;  %vm282_vm2 = vcmp.eq.s32.totalorder %v1107_v0, %v1112_v3  ;;  %vm283_vm3 = vcmp.eq.s32.totalorder %v1110_v1, %v1112_v3 }
  0xe9   :  { %v257_v3 = vadd.f32 %v253_v4, %v238_v54  ;;  %v288_v12 = vsel %vm280_vm0, %v286_v56, 0.0  ;;  %v289_v14 = vsel %vm281_vm1, %v286_v56, 0.0  ;;  %v290_v15 = vsel %vm282_vm2, %v286_v56, 0.0 }
  0xea   :  { %v291_v16 = vsel %vm283_vm3, %v286_v56, 0.0  ;;  %v292_v62 = vadd.f32 %v288_v12, %v273_v17  ;;  %v293_v21 = vadd.f32 %v289_v14, %v274_v18  ;;  %v294_v22 = vadd.f32 %v290_v15, %v275_v19  ;;  %v400_v56 = vpop.permute.xlu0 %399 }
  0xeb   :  { %v276_v20 = vadd.f32 %v272_v6, %v257_v3  ;;  %vm375_vm0 = vcmp.eq.s32.totalorder %v1099_v61, %v374_v38  ;;  %vm376_vm1 = vcmp.eq.s32.totalorder %v1104_v63, %v374_v38  ;;  %vm377_vm2 = vcmp.eq.s32.totalorder %v1107_v0, %v374_v38 }
  0xec   :  { %v1126_v13 = vpop.permute.xlu1 %297  ;;  %vm378_vm3 = vcmp.eq.s32.totalorder %v1110_v1, %v374_v38 }
  0xed   :  { %v295_v23 = vadd.f32 %v291_v16, %v276_v20  ;;  %vm299_vm8 = vcmp.eq.s32.totalorder %v1099_v61, %v1126_v13  ;;  %vm300_vm9 = vcmp.eq.s32.totalorder %v1104_v63, %v1126_v13  ;;  %vm301_vm10 = vcmp.eq.s32.totalorder %v1107_v0, %v1126_v13 }
  0xee   :  { %vm302_vm11 = vcmp.eq.s32.totalorder %v1110_v1, %v1126_v13 }
  0xf0   :  { %v1128_v27 = vpop.permute.xlu1 %304 }
  0xf1   :  { %v307_v26 = vsel %vm299_vm8, %v1128_v27, 0.0  ;;  %v308_v28 = vsel %vm300_vm9, %v1128_v27, 0.0  ;;  %v309_v29 = vsel %vm301_vm10, %v1128_v27, 0.0  ;;  %v310_v30 = vsel %vm302_vm11, %v1128_v27, 0.0 }
  0xf2   :  { %v311_v33 = vadd.f32 %v307_v26, %v292_v62  ;;  %v312_v34 = vadd.f32 %v308_v28, %v293_v21  ;;  %v313_v35 = vadd.f32 %v309_v29, %v294_v22  ;;  %v314_v36 = vadd.f32 %v310_v30, %v295_v23 }
  0xf5   :  { %v1154_v37 = vpop.permute.xlu1 %323 }
  0xf6   :  { %v326_v13 = vsel %vm318_vm4, %v1154_v37, 0.0  ;;  %v327_v27 = vsel %vm319_vm5, %v1154_v37, 0.0  ;;  %v328_v31 = vsel %vm320_vm6, %v1154_v37, 0.0  ;;  %v329_v32 = vsel %vm321_vm7, %v1154_v37, 0.0 }
  0xf7   :  { %v330_v44 = vadd.f32 %v326_v13, %v311_v33  ;;  %v331_v45 = vadd.f32 %v327_v27, %v312_v34  ;;  %v332_v46 = vadd.f32 %v328_v31, %v313_v35  ;;  %v333_v47 = vadd.f32 %v329_v32, %v314_v36 }
  0xfa   :  { %v1160_v55 = vpop.permute.xlu1 %335 }
  0xfb   :  { %vm337_vm12 = vcmp.eq.s32.totalorder %v1099_v61, %v1160_v55  ;;  %vm338_vm13 = vcmp.eq.s32.totalorder %v1104_v63, %v1160_v55  ;;  %vm339_vm14 = vcmp.eq.s32.totalorder %v1107_v0, %v1160_v55  ;;  %vm340_vm15 = vcmp.eq.s32.totalorder %v1110_v1, %v1160_v55 }
  0xfc   :  { %v345_v40 = vsel %vm337_vm12, %v343_v25, 0.0  ;;  %v346_v41 = vsel %vm338_vm13, %v343_v25, 0.0  ;;  %v347_v42 = vsel %vm339_vm14, %v343_v25, 0.0  ;;  %v348_v43 = vsel %vm340_vm15, %v343_v25, 0.0 }
  0xfd   :  { %v349_v37 = vadd.f32 %v345_v40, %v330_v44  ;;  %v350_v48 = vadd.f32 %v346_v41, %v331_v45  ;;  %v351_v49 = vadd.f32 %v347_v42, %v332_v46  ;;  %v352_v50 = vadd.f32 %v348_v43, %v333_v47 }
  0xff   :  { %v1194_v11 = vpop.permute.xlu1 %354 }
 0x100   :  { %vm356_vm4 = vcmp.eq.s32.totalorder %v1099_v61, %v1194_v11  ;;  %vm357_vm5 = vcmp.eq.s32.totalorder %v1104_v63, %v1194_v11  ;;  %vm358_vm6 = vcmp.eq.s32.totalorder %v1107_v0, %v1194_v11  ;;  %vm359_vm7 = vcmp.eq.s32.totalorder %v1110_v1, %v1194_v11 }
 0x103   :  { %v362_v24 = vpop.permute.xlu1 %361 }
 0x104   :  { %v364_v52 = vsel %vm356_vm4, %v362_v24, 0.0  ;;  %v365_v53 = vsel %vm357_vm5, %v362_v24, 0.0  ;;  %v366_v54 = vsel %vm358_vm6, %v362_v24, 0.0  ;;  %v367_v55 = vsel %vm359_vm7, %v362_v24, 0.0 }
 0x105   :  { %v368_v57 = vadd.f32 %v364_v52, %v349_v37  ;;  %v370_v59 = vadd.f32 %v366_v54, %v351_v49  ;;  %v369_v5 = vadd.f32 %v365_v53, %v350_v48  ;;  %v371_v6 = vadd.f32 %v367_v55, %v352_v50 }
 0x108   :  { %v381_v39 = vpop.permute.xlu1 %380 }
 0x109   :  { %v383_v58 = vsel %vm375_vm0, %v381_v39, 0.0  ;;  %v385_v60 = vsel %vm377_vm2, %v381_v39, 0.0  ;;  %v384_v2 = vsel %vm376_vm1, %v381_v39, 0.0  ;;  %v386_v4 = vsel %vm378_vm3, %v381_v39, 0.0 }
 0x10a   :  { %v387_v11 = vadd.f32 %v383_v58, %v368_v57  ;;  %v389_v12 = vadd.f32 %v385_v60, %v370_v59  ;;  %v388_v14 = vadd.f32 %v384_v2, %v369_v5  ;;  %v390_v15 = vadd.f32 %v386_v4, %v371_v6 }
 0x10d   :  { %v393_v51 = vpop.permute.xlu1 %392 }
 0x10e   :  { %vm394_vm8 = vcmp.eq.s32.totalorder %v1099_v61, %v393_v51  ;;  %vm396_vm9 = vcmp.eq.s32.totalorder %v1107_v0, %v393_v51  ;;  %vm395_vm10 = vcmp.eq.s32.totalorder %v1104_v63, %v393_v51  ;;  %vm397_vm11 = vcmp.eq.s32.totalorder %v1110_v1, %v393_v51 }
 0x10f   :  { %v402_v7 = vsel %vm394_vm8, %v400_v56, 0.0  ;;  %v404_v8 = vsel %vm396_vm9, %v400_v56, 0.0  ;;  %v403_v3 = vsel %vm395_vm10, %v400_v56, 0.0  ;;  %v405_v10 = vsel %vm397_vm11, %v400_v56, 0.0 }
 0x110   :  { %v406_v16 = vadd.f32 %v402_v7, %v387_v11  ;;  %v408_v17 = vadd.f32 %v404_v8, %v389_v12  ;;  %v407_v18 = vadd.f32 %v403_v3, %v388_v14  ;;  %v409_v19 = vadd.f32 %v405_v10, %v390_v15 }
 0x112   :  { %v412_v9 = vpop.permute.xlu1 %411 }
 0x113   :  { %vm413_vm12 = vcmp.eq.s32.totalorder %v1099_v61, %v412_v9  ;;  %vm415_vm13 = vcmp.eq.s32.totalorder %v1107_v0, %v412_v9  ;;  %vm414_vm14 = vcmp.eq.s32.totalorder %v1104_v63, %v412_v9  ;;  %vm416_vm15 = vcmp.eq.s32.totalorder %v1110_v1, %v412_v9 }
 0x116   :  { %v419_v20 = vpop.permute.xlu1 %418 }
 0x117   :  { %v421_v62 = vsel %vm413_vm12, %v419_v20, 0.0  ;;  %v423_v21 = vsel %vm415_vm13, %v419_v20, 0.0  ;;  %v422_v22 = vsel %vm414_vm14, %v419_v20, 0.0  ;;  %v424_v23 = vsel %vm416_vm15, %v419_v20, 0.0 }
 0x118   :  { %v426_v24 = vadd.f32 %v422_v22, %v407_v18  ;;  %v428_v25 = vadd.f32 %v424_v23, %v409_v19  ;;  %v425_v26 = vadd.f32 %v421_v62, %v406_v16  ;;  %v427_v28 = vadd.f32 %v423_v21, %v408_v17 }
 0x11a   :  { %v430_v29 = vpack.c.bf16 %v426_v24, %v426_v24  ;;  %v432_v30 = vpack.c.bf16 %v428_v25, %v428_v25  ;;  %v429_v13 = vpack.c.bf16 %v425_v26, %v425_v26  ;;  %v431_v27 = vpack.c.bf16 %v427_v28, %v427_v28 }
 0x11c   :  { %657 = vmatprep.mubr.bf16.mxu0 %v430_v29  ;;  %697 = vmatprep.mubr.bf16.mxu1 %v432_v30 }
 0x11d   :  { %658 = vmatmul.mubr.bf16.vlgmr.msra.gmra.mrb[0].mxu0 %v429_v13  ;;  %698 = vmatmul.mubr.bf16.vlgmr.msra.gmra.mrb[0].mxu1 %v431_v27 }
 0x1f0   :  { %v771_v61 = vpop.f32.mrb[0].mxu0  ;;  %v793_v63 = vpop.f32.mrb[0].mxu1 }
 0x1f1   :  { %v772_v0 = vpop.f32.mrb[1].mxu0  ;;  %v794_v1 = vpop.f32.mrb[1].mxu1 }
 0x1f2   :  { %v773_v31 = vadd.f32 %v772_v0, %v771_v61  ;;  %v795_v32 = vadd.f32 %v794_v1, %v793_v63  ;;  %v774_v33 = vpop.f32.mrb[2].mxu0  ;;  %v796_v34 = vpop.f32.mrb[2].mxu1 }
 0x1f3   :  { %v775_v35 = vpop.f32.mrb[3].mxu0  ;;  %v797_v36 = vpop.f32.mrb[3].mxu1 }
 0x1f4   :  { %v700_v38 = vadd.f32 %v795_v32, %v773_v31 }
 0x1f6   :  { %v705_v39 = vpack.c.bf16 %v700_v38, %v700_v38 }
 0x1f8   :  { %706 = vst [vmem:[#allocation8] sm:$0xf] %v705_v39 }
 0x1f9   :  { %958 = shalt.err (!%p955_p0)
}
 0x1fa   :  { %s959_s25 = scalar_lea.hbm %s1275_s3, 64 }
 0x1fb   :  { %p960_p1 = scmp.ne.s32.totalorder %s1275_s3, %s959_s25  ;;  %p963_p2 = scmp.lt.u32.totalorder %s959_s25, %s1275_s3 }
 0x1fd   :  { %p965_p3 = pnand %p963_p2, %p960_p1 }
 0x1ff   :  { %968 = shalt.err (!%p965_p3)
}
 0x200   :  { %716 = dma.vmem_to_hbm [thread:$0]  %s714_s21, 64, %s1275_s3, [#allocation4]  }
 0x201   :  { %973 = dma.done.wait [#allocation4], 64  }
 0x202   :  { %974 = vsyncadd [#allocation4], 4294967232 }
 0x203   :  { %720 = vsyncpa [#allocation3], 1 }
 0x204   :  { %721 = vsyncpa [#allocation6], 1 }
 0x205   :  { %722 = vsyncpa [#allocation4], 1 }

// kernel: tpu_custom_call.1
= control target key start
LH: loop header
LB: loop body
LE: loop exit
PB: predicated region body
PF: predicated region fallthrough
CT: control target
= control target key end

     0   :  { %8 = vsyncpa [#allocation3], 0  ;;  %s1272_s0 = inlined_call_operand.hbm [shape: s32[8,16], index: 0, kind: input, shape index: {}]   ;;  %s1273_s1 = inlined_call_operand.hbm [shape: f32[8,16], index: 1, kind: input, shape index: {}]   ;;  %s1274_s2 = inlined_call_operand.hbm [shape: bf16[512,128], index: 2, kind: input, shape index: {}]   ;;  %s1275_s3 = inlined_call_operand.hbm [shape: bf16[8,128], index: 3, kind: output, shape index: {}]  }
   0x1   :  { %9 = vsyncpa [#allocation6], 0 }
   0x2   :  { %10 = vsyncpa [#allocation4], 0  ;;  %s975_s12 = smov [#allocation5]   ;;  %s976_s14 = smov [#allocation2]  }
   0x3   :  { %s27_s13 = sshll.u32 %s975_s12, 4  ;;  %s17_s15 = sshll.u32 %s976_s14, 4  ;;  %s28_s13 = int_to_ptr.vmem [resolvable:$true] %s27_s13  ;;  %s18_s15 = int_to_ptr.vmem [resolvable:$true] %s17_s15 }
   0x4   :  { %s881_s18 = scalar_lea.hbm %s1273_s1, 128 }
   0x5   :  { %p882_p0 = scmp.ne.s32.totalorder %s1273_s1, %s881_s18  ;;  %p885_p1 = scmp.lt.u32.totalorder %s881_s18, %s1273_s1 }
   0x7   :  { %p887_p2 = pnand %p885_p1, %p882_p0 }
   0x9   :  { %890 = shalt.err (!%p887_p2)
}
   0xa   :  { %s891_s23 = scalar_lea.vmem %s28_s13, 128  ;;  %p896_p4 = scmp.lt.s32.totalorder %s28_s13, %s28_s13 }
   0xb   :  { %p892_p3 = scmp.ne.s32.totalorder %s28_s13, %s891_s23  ;;  %p897_p5 = scmp.lt.s32.totalorder %s891_s23, %s891_s23 }
   0xd   :  { %p898_p6 = por %p897_p5, %p896_p4 }
   0xf   :  { %p899_p7 = pnand %p898_p6, %p892_p3 }
  0x11   :  { %902 = shalt.err (!%p899_p7)
}
  0x12   :  { %30 = dma.hbm_to_vmem [thread:$0]  %s1273_s1, 128, %s28_s13, [#allocation6]  }
  0x13   :  { %s903_s28 = scalar_lea.hbm %s1272_s0, 128 }
  0x14   :  { %p904_p8 = scmp.ne.s32.totalorder %s1272_s0, %s903_s28  ;;  %p907_p9 = scmp.lt.u32.totalorder %s903_s28, %s1272_s0 }
  0x16   :  { %p909_p10 = pnand %p907_p9, %p904_p8 }
  0x18   :  { %912 = shalt.err (!%p909_p10)
}
  0x19   :  { %s913_s6 = scalar_lea.vmem %s18_s15, 128  ;;  %p918_p12 = scmp.lt.s32.totalorder %s18_s15, %s18_s15 }
  0x1a   :  { %p914_p11 = scmp.ne.s32.totalorder %s18_s15, %s913_s6  ;;  %p919_p13 = scmp.lt.s32.totalorder %s913_s6, %s913_s6 }
  0x1c   :  { %p920_p0 = por %p919_p13, %p918_p12 }
  0x1e   :  { %p921_p1 = pnand %p920_p0, %p914_p11 }
  0x20   :  { %924 = shalt.err (!%p921_p1)
}
  0x21   :  { %20 = dma.hbm_to_vmem [thread:$0]  %s1272_s0, 128, %s18_s15, [#allocation3]  }
  0x22   :  { %s977_s8 = smov [#allocation7]   ;;  %s925_s12 = scalar_lea.hbm %s1274_s2, 4096 }
  0x23   :  { %s36_s9 = sshll.u32 %s977_s8, 4  ;;  %p926_p2 = scmp.ne.s32.totalorder %s1274_s2, %s925_s12  ;;  %s37_s9 = int_to_ptr.vmem [resolvable:$true] %s36_s9 }
  0x24   :  { %p929_p3 = scmp.lt.u32.totalorder %s925_s12, %s1274_s2 }
  0x26   :  { %p931_p4 = pnand %p929_p3, %p926_p2 }
  0x28   :  { %934 = shalt.err (!%p931_p4)
}
  0x29   :  { %s935_s18 = scalar_lea.vmem %s37_s9, 4096  ;;  %p940_p6 = scmp.lt.s32.totalorder %s37_s9, %s37_s9 }
  0x2a   :  { %p936_p5 = scmp.ne.s32.totalorder %s37_s9, %s935_s18  ;;  %p941_p7 = scmp.lt.s32.totalorder %s935_s18, %s935_s18 }
  0x2c   :  { %p942_p8 = por %p941_p7, %p940_p6 }
  0x2e   :  { %p943_p9 = pnand %p942_p8, %p936_p5 }
  0x30   :  { %946 = shalt.err (!%p943_p9)
}
  0x31   :  { %s978_s0 = smov 64   ;;  %s979_s15 = smov 4  }
  0x32   :  { %42 = dma.hbm_to_vmem [thread:$0]  %s1274_s2, 4096, %s37_s9, [#allocation6], %s978_s0, %s978_s0, %s979_s15  }
  0x33   :  { %969 = dma.done.wait [#allocation3], 128  }
  0x34   :  { %970 = vsyncadd [#allocation3], 4294967168 }
  0x35   :  { %971 = dma.done.wait [#allocation6], 4224  }
  0x36   :  { %972 = vsyncadd [#allocation6], 4294963072  ;;  %v980_v0 = vmov 0   ;;  %v1053_v1 = vld [vmem:[#allocation5] sm:$0xff]  ;;  %v1055_v2 = vld [vmem:[#allocation2] sm:$0xff]  ;;  %v981_v3 = vmov 1   ;;  %v55_v58 = vlaneseq }
  0x37   :  { %823 = vset.pattern.permute.xlu1 %v980_v0  ;;  %821 = vset.pattern.permute.xlu0 %v980_v0  ;;  %v982_v4 = vmov 2   ;;  %v983_v5 = vmov 3   ;;  %v984_v6 = vmov 4   ;;  %v985_v7 = vmov 5   ;;  %v849_v17 = vld [vmem:[#allocation7 + $0x40] sm:$0xff]   ;;  %v853_v22 = vld [vmem:[#allocation7 + $0x48] sm:$0xff]  }
  0x38   :  { %133 = vperm.xlu1 %823, %v1053_v1   ;;  %125 = vperm.xlu0 %821, %v1055_v2   ;;  %v986_v8 = vmov 7   ;;  %v987_v9 = vmov 8   ;;  %v988_v10 = vmov 6   ;;  %v989_v11 = vmov 10   ;;  %v850_v18 = vld [vmem:[#allocation7 + $0xc0] sm:$0xff]   ;;  %v854_v23 = vld [vmem:[#allocation7 + $0xc8] sm:$0xff]  }
  0x39   :  { %v990_v12 = vmov 11   ;;  %v991_v13 = vmov 13   ;;  %v992_v14 = vmov 14   ;;  %v993_v15 = vmov 9   ;;  %v851_v19 = vld [vmem:[#allocation7] sm:$0xff]   ;;  %755 = vmatprep.subr.bf16.mxu0 %v849_v17  ;;  %777 = vmatprep.subr.bf16.mxu1 %v850_v18  ;;  %v855_v24 = vld [vmem:[#allocation7 + $0x8] sm:$0xff]  }
  0x3a   :  { %v994_v16 = vmov 15   ;;  %v852_v20 = vld [vmem:[#allocation7 + $0x80] sm:$0xff]   ;;  %756 = vmatpush3.bf16.msra.mxu0 %v851_v19  ;;  %v995_v21 = vmov 12   ;;  %v856_v25 = vld [vmem:[#allocation7 + $0x88] sm:$0xff]   ;;  %v857_v26 = vld [vmem:[#allocation7 + $0x50] sm:$0xff]   ;;  %v1099_v61 = vand.u32 127, %v55_v58 }
  0x3b   :  { %778 = vmatpush3.bf16.msra.mxu1 %v852_v20  ;;  %757 = vmatprep.subr.bf16.mxu0 %v853_v22  ;;  %v858_v27 = vld [vmem:[#allocation7 + $0xd0] sm:$0xff]   ;;  %v861_v30 = vld [vmem:[#allocation7 + $0x58] sm:$0xff]   ;;  %v865_v34 = vld [vmem:[#allocation7 + $0x60] sm:$0xff]   ;;  %s996_s2 = smov [#allocation8]  }
  0x3c   :  { %824 = vset.pattern.permute.xlu1 %v981_v3  ;;  %822 = vset.pattern.permute.xlu0 %v981_v3  ;;  %v859_v28 = vld [vmem:[#allocation7 + $0x10] sm:$0xff]   ;;  %v862_v31 = vld [vmem:[#allocation7 + $0xd8] sm:$0xff]   ;;  %v866_v35 = vld [vmem:[#allocation7 + $0xe0] sm:$0xff]   ;;  %v1104_v63 = vadd.s32 128, %v1099_v61  ;;  %v1107_v0 = vadd.s32 256, %v1099_v61  ;;  %s713_s21 = sshll.u32 %s996_s2, 4  ;;  %s714_s21 = int_to_ptr.vmem [resolvable:$true] %s713_s21 }
  0x3d   :  { %152 = vperm.xlu1 %824, %v1053_v1   ;;  %145 = vperm.xlu0 %822, %v1055_v2   ;;  %v860_v29 = vld [vmem:[#allocation7 + $0x90] sm:$0xff]   ;;  %v863_v32 = vld [vmem:[#allocation7 + $0x18] sm:$0xff]   ;;  %v867_v36 = vld [vmem:[#allocation7 + $0x20] sm:$0xff]   ;;  %s947_s22 = scalar_lea.vmem %s714_s21, 64  ;;  %p952_p11 = scmp.lt.s32.totalorder %s714_s21, %s714_s21 }
  0x3e   :  { %779 = vmatprep.subr.bf16.mxu1 %v854_v23  ;;  %758 = vmatpush3.bf16.msra.mxu0 %v855_v24  ;;  %v864_v33 = vld [vmem:[#allocation7 + $0x98] sm:$0xff]   ;;  %v868_v37 = vld [vmem:[#allocation7 + $0xa0] sm:$0xff]   ;;  %v869_v38 = vld [vmem:[#allocation7 + $0x68] sm:$0xff]   ;;  %p948_p10 = scmp.ne.s32.totalorder %s714_s21, %s947_s22  ;;  %p953_p12 = scmp.lt.s32.totalorder %s947_s22, %s947_s22 }
  0x3f   :  { %780 = vmatpush3.bf16.msra.mxu1 %v856_v25  ;;  %759 = vmatprep.subr.bf16.mxu0 %v857_v26  ;;  %v870_v39 = vld [vmem:[#allocation7 + $0xe8] sm:$0xff]   ;;  %v873_v42 = vld [vmem:[#allocation7 + $0x70] sm:$0xff]   ;;  %v877_v46 = vld [vmem:[#allocation7 + $0x78] sm:$0xff]  }
  0x40   :  { %781 = vmatprep.subr.bf16.mxu1 %v858_v27  ;;  %v871_v40 = vld [vmem:[#allocation7 + $0x28] sm:$0xff]   ;;  %v874_v43 = vld [vmem:[#allocation7 + $0xf0] sm:$0xff]   ;;  %v878_v47 = vld [vmem:[#allocation7 + $0xf8] sm:$0xff]   ;;  %p954_p13 = por %p953_p12, %p952_p11 }
  0x41   :  { %825 = vset.pattern.permute.xlu1 %v982_v4  ;;  %826 = vset.pattern.permute.xlu0 %v982_v4  ;;  %v872_v41 = vld [vmem:[#allocation7 + $0xa8] sm:$0xff]   ;;  %v875_v44 = vld [vmem:[#allocation7 + $0x30] sm:$0xff]   ;;  %v879_v48 = vld [vmem:[#allocation7 + $0x38] sm:$0xff]  }
  0x42   :  { %164 = vperm.xlu1 %825, %v1055_v2   ;;  %171 = vperm.xlu0 %826, %v1053_v1   ;;  %v876_v45 = vld [vmem:[#allocation7 + $0xb0] sm:$0xff]   ;;  %v880_v49 = vld [vmem:[#allocation7 + $0xb8] sm:$0xff]   ;;  %p955_p0 = pnand %p954_p13, %p948_p10 }
  0x43   :  { %760 = vmatpush3.bf16.msra.mxu0 %v859_v28  ;;  %782 = vmatpush3.bf16.msra.mxu1 %v860_v29 }
  0x44   :  { %761 = vmatprep.subr.bf16.mxu0 %v861_v30  ;;  %783 = vmatprep.subr.bf16.mxu1 %v862_v31 }
  0x46   :  { %827 = vset.pattern.permute.xlu1 %v983_v5  ;;  %828 = vset.pattern.permute.xlu0 %v984_v6 }
  0x47   :  { %183 = vperm.xlu1 %827, %v1055_v2   ;;  %202 = vperm.xlu0 %828, %v1055_v2  }
  0x48   :  { %762 = vmatpush3.bf16.msra.mxu0 %v863_v32  ;;  %784 = vmatpush3.bf16.msra.mxu1 %v864_v33 }
  0x49   :  { %763 = vmatprep.subr.bf16.mxu0 %v865_v34  ;;  %785 = vmatprep.subr.bf16.mxu1 %v866_v35 }
  0x4b   :  { %190 = vperm.xlu1 %827, %v1053_v1   ;;  %831 = vset.pattern.permute.xlu0 %v985_v7 }
  0x4c   :  { %228 = vperm.xlu0 %831, %v1053_v1   ;;  %764 = vmatpush3.bf16.msra.mxu0 %v867_v36 }
  0x4d   :  { %786 = vmatpush3.bf16.msra.mxu1 %v868_v37  ;;  %765 = vmatprep.subr.bf16.mxu0 %v869_v38 }
  0x4e   :  { %787 = vmatprep.subr.bf16.mxu1 %v870_v39 }
  0x4f   :  { %829 = vset.pattern.permute.xlu1 %v984_v6 }
  0x50   :  { %209 = vperm.xlu1 %829, %v1053_v1   ;;  %833 = vset.pattern.permute.xlu0 %v986_v8 }
  0x51   :  { %259 = vperm.xlu0 %833, %v1055_v2   ;;  %766 = vmatpush3.bf16.msra.mxu0 %v871_v40 }
  0x52   :  { %788 = vmatpush3.bf16.msra.mxu1 %v872_v41  ;;  %767 = vmatprep.subr.bf16.mxu0 %v873_v42 }
  0x53   :  { %789 = vmatprep.subr.bf16.mxu1 %v874_v43 }
  0x54   :  { %830 = vset.pattern.permute.xlu1 %v985_v7 }
  0x55   :  { %221 = vperm.xlu1 %830, %v1055_v2   ;;  %836 = vset.pattern.permute.xlu0 %v987_v9 }
  0x56   :  { %285 = vperm.xlu0 %836, %v1053_v1   ;;  %768 = vmatpush3.bf16.msra.mxu0 %v875_v44 }
  0x57   :  { %790 = vmatpush3.bf16.msra.mxu1 %v876_v45  ;;  %769 = vmatprep.subr.bf16.mxu0 %v877_v46 }
  0x58   :  { %791 = vmatprep.subr.bf16.mxu1 %v878_v47 }
  0x59   :  { %832 = vset.pattern.permute.xlu1 %v988_v10 }
  0x5a   :  { %240 = vperm.xlu1 %832, %v1055_v2   ;;  %838 = vset.pattern.permute.xlu0 %v989_v11 }
  0x5b   :  { %316 = vperm.xlu0 %838, %v1055_v2   ;;  %770 = vmatpush3.bf16.msra.mxu0 %v879_v48 }
  0x5c   :  { %792 = vmatpush3.bf16.msra.mxu1 %v880_v49 }
  0x5e   :  { %247 = vperm.xlu1 %832, %v1053_v1  }
  0x5f   :  { %841 = vset.pattern.permute.xlu0 %v990_v12 }
  0x60   :  { %342 = vperm.xlu0 %841, %v1053_v1  }
  0x62   :  { %834 = vset.pattern.permute.xlu1 %v986_v8 }
  0x63   :  { %266 = vperm.xlu1 %834, %v1053_v1  }
  0x64   :  { %843 = vset.pattern.permute.xlu0 %v991_v13 }
  0x65   :  { %373 = vperm.xlu0 %843, %v1055_v2  }
  0x67   :  { %835 = vset.pattern.permute.xlu1 %v987_v9 }
  0x68   :  { %278 = vperm.xlu1 %835, %v1055_v2  }
  0x69   :  { %846 = vset.pattern.permute.xlu0 %v992_v14 }
  0x6a   :  { %399 = vperm.xlu0 %846, %v1053_v1  }
  0x6c   :  { %837 = vset.pattern.permute.xlu1 %v993_v15 }
  0x6d   :  { %297 = vperm.xlu1 %837, %v1055_v2  }
  0x6e   :  { %848 = vset.pattern.permute.xlu0 %v994_v16 }
  0x71   :  { %304 = vperm.xlu1 %837, %v1053_v1  }
  0x75   :  { %839 = vset.pattern.permute.xlu1 %v989_v11 }
  0x76   :  { %323 = vperm.xlu1 %839, %v1053_v1  }
  0x7a   :  { %840 = vset.pattern.permute.xlu1 %v990_v12 }
  0x7b   :  { %335 = vperm.xlu1 %840, %v1055_v2  }
  0x7f   :  { %842 = vset.pattern.permute.xlu1 %v995_v21 }
  0x80   :  { %354 = vperm.xlu1 %842, %v1055_v2  }
  0x84   :  { %361 = vperm.xlu1 %842, %v1053_v1  }
  0x88   :  { %844 = vset.pattern.permute.xlu1 %v991_v13 }
  0x89   :  { %380 = vperm.xlu1 %844, %v1053_v1  }
  0x8d   :  { %845 = vset.pattern.permute.xlu1 %v992_v14 }
  0x8e   :  { %392 = vperm.xlu1 %845, %v1055_v2  }
  0x92   :  { %847 = vset.pattern.permute.xlu1 %v994_v16 }
  0x93   :  { %411 = vperm.xlu1 %847, %v1055_v2  }
  0x97   :  { %418 = vperm.xlu1 %847, %v1053_v1   ;;  %v1110_v1 = vadd.s32 384, %v1099_v61 }
  0xb7   :  { %v134_v50 = vpop.permute.xlu1 %133  ;;  %v126_v60 = vpop.permute.xlu0 %125 }
  0xb8   :  { %vm127_vm4 = vcmp.eq.s32.totalorder %v1099_v61, %v126_v60  ;;  %vm128_vm5 = vcmp.eq.s32.totalorder %v1104_v63, %v126_v60  ;;  %vm129_vm6 = vcmp.eq.s32.totalorder %v1107_v0, %v126_v60  ;;  %vm130_vm7 = vcmp.eq.s32.totalorder %v1110_v1, %v126_v60 }
  0xb9   :  { %v136_v9 = vsel %vm127_vm4, %v134_v50, 0.0  ;;  %v137_v10 = vsel %vm128_vm5, %v134_v50, 0.0  ;;  %v138_v11 = vsel %vm129_vm6, %v134_v50, 0.0  ;;  %v139_v12 = vsel %vm130_vm7, %v134_v50, 0.0 }
  0xbc   :  { %v153_v51 = vpop.permute.xlu1 %152  ;;  %v146_v2 = vpop.permute.xlu0 %145 }
  0xbd   :  { %vm147_vm0 = vcmp.eq.s32.totalorder %v1099_v61, %v146_v2  ;;  %vm148_vm1 = vcmp.eq.s32.totalorder %v1104_v63, %v146_v2  ;;  %vm149_vm2 = vcmp.eq.s32.totalorder %v1107_v0, %v146_v2  ;;  %vm150_vm3 = vcmp.eq.s32.totalorder %v1110_v1, %v146_v2 }
  0xbe   :  { %v155_v5 = vsel %vm147_vm0, %v153_v51, 0.0  ;;  %v156_v6 = vsel %vm148_vm1, %v153_v51, 0.0  ;;  %v157_v7 = vsel %vm149_vm2, %v153_v51, 0.0  ;;  %v158_v8 = vsel %vm150_vm3, %v153_v51, 0.0 }
  0xbf   :  { %v159_v18 = vadd.f32 %v155_v5, %v136_v9  ;;  %v160_v19 = vadd.f32 %v156_v6, %v137_v10  ;;  %v161_v20 = vadd.f32 %v157_v7, %v138_v11  ;;  %v162_v21 = vadd.f32 %v158_v8, %v139_v12 }
  0xc1   :  { %v165_v52 = vpop.permute.xlu1 %164  ;;  %v172_v4 = vpop.permute.xlu0 %171 }
  0xc2   :  { %vm166_vm8 = vcmp.eq.s32.totalorder %v1099_v61, %v165_v52  ;;  %vm167_vm9 = vcmp.eq.s32.totalorder %v1104_v63, %v165_v52  ;;  %vm168_vm10 = vcmp.eq.s32.totalorder %v1107_v0, %v165_v52  ;;  %vm169_vm11 = vcmp.eq.s32.totalorder %v1110_v1, %v165_v52 }
  0xc3   :  { %v174_v14 = vsel %vm166_vm8, %v172_v4, 0.0  ;;  %v175_v15 = vsel %vm167_vm9, %v172_v4, 0.0  ;;  %v176_v16 = vsel %vm168_vm10, %v172_v4, 0.0  ;;  %v177_v17 = vsel %vm169_vm11, %v172_v4, 0.0 }
  0xc4   :  { %v178_v23 = vadd.f32 %v174_v14, %v159_v18  ;;  %v179_v24 = vadd.f32 %v175_v15, %v160_v19  ;;  %v180_v25 = vadd.f32 %v176_v16, %v161_v20  ;;  %v181_v26 = vadd.f32 %v177_v17, %v162_v21 }
  0xc6   :  { %v1089_v53 = vpop.permute.xlu1 %183  ;;  %v203_v22 = vpop.permute.xlu0 %202 }
  0xc7   :  { %vm185_vm12 = vcmp.eq.s32.totalorder %v1099_v61, %v1089_v53  ;;  %vm186_vm13 = vcmp.eq.s32.totalorder %v1104_v63, %v1089_v53  ;;  %vm187_vm14 = vcmp.eq.s32.totalorder %v1107_v0, %v1089_v53  ;;  %vm188_vm15 = vcmp.eq.s32.totalorder %v1110_v1, %v1089_v53 }
  0xc8   :  { %vm204_vm0 = vcmp.eq.s32.totalorder %v1099_v61, %v203_v22  ;;  %vm205_vm1 = vcmp.eq.s32.totalorder %v1104_v63, %v203_v22  ;;  %vm206_vm2 = vcmp.eq.s32.totalorder %v1107_v0, %v203_v22  ;;  %vm207_vm3 = vcmp.eq.s32.totalorder %v1110_v1, %v203_v22 }
  0xca   :  { %v191_v54 = vpop.permute.xlu1 %190 }
  0xcb   :  { %v229_v28 = vpop.permute.xlu0 %228  ;;  %v193_v29 = vsel %vm185_vm12, %v191_v54, 0.0  ;;  %v194_v30 = vsel %vm186_vm13, %v191_v54, 0.0  ;;  %v195_v31 = vsel %vm187_vm14, %v191_v54, 0.0  ;;  %v196_v32 = vsel %vm188_vm15, %v191_v54, 0.0 }
  0xcc   :  { %v197_v38 = vadd.f32 %v193_v29, %v178_v23  ;;  %v198_v39 = vadd.f32 %v194_v30, %v179_v24  ;;  %v199_v40 = vadd.f32 %v195_v31, %v180_v25  ;;  %v200_v41 = vadd.f32 %v196_v32, %v181_v26 }
  0xcf   :  { %v1091_v55 = vpop.permute.xlu1 %209 }
  0xd0   :  { %v212_v33 = vsel %vm204_vm0, %v1091_v55, 0.0  ;;  %v213_v34 = vsel %vm205_vm1, %v1091_v55, 0.0  ;;  %v214_v35 = vsel %vm206_vm2, %v1091_v55, 0.0  ;;  %v215_v36 = vsel %vm207_vm3, %v1091_v55, 0.0  ;;  %v260_v42 = vpop.permute.xlu0 %259 }
  0xd1   :  { %v216_v47 = vadd.f32 %v212_v33, %v197_v38  ;;  %v217_v48 = vadd.f32 %v213_v34, %v198_v39  ;;  %v218_v49 = vadd.f32 %v214_v35, %v199_v40  ;;  %v219_v50 = vadd.f32 %v215_v36, %v200_v41 }
  0xd2   :  { %vm261_vm8 = vcmp.eq.s32.totalorder %v1099_v61, %v260_v42  ;;  %vm262_vm9 = vcmp.eq.s32.totalorder %v1104_v63, %v260_v42  ;;  %vm263_vm10 = vcmp.eq.s32.totalorder %v1107_v0, %v260_v42  ;;  %vm264_vm11 = vcmp.eq.s32.totalorder %v1110_v1, %v260_v42 }
  0xd4   :  { %v1093_v56 = vpop.permute.xlu1 %221 }
  0xd5   :  { %vm223_vm4 = vcmp.eq.s32.totalorder %v1099_v61, %v1093_v56  ;;  %vm224_vm5 = vcmp.eq.s32.totalorder %v1104_v63, %v1093_v56  ;;  %vm225_vm6 = vcmp.eq.s32.totalorder %v1107_v0, %v1093_v56  ;;  %vm226_vm7 = vcmp.eq.s32.totalorder %v1110_v1, %v1093_v56  ;;  %v286_v56 = vpop.permute.xlu0 %285 }
  0xd6   :  { %v231_v43 = vsel %vm223_vm4, %v229_v28, 0.0  ;;  %v232_v44 = vsel %vm224_vm5, %v229_v28, 0.0  ;;  %v233_v45 = vsel %vm225_vm6, %v229_v28, 0.0  ;;  %v234_v46 = vsel %vm226_vm7, %v229_v28, 0.0 }
  0xd7   :  { %v235_v51 = vadd.f32 %v231_v43, %v216_v47  ;;  %v236_v52 = vadd.f32 %v232_v44, %v217_v48  ;;  %v237_v53 = vadd.f32 %v233_v45, %v218_v49  ;;  %v238_v54 = vadd.f32 %v234_v46, %v219_v50 }
  0xd9   :  { %v1095_v57 = vpop.permute.xlu1 %240 }
  0xda   :  { %vm242_vm12 = vcmp.eq.s32.totalorder %v1099_v61, %v1095_v57  ;;  %vm243_vm13 = vcmp.eq.s32.totalorder %v1104_v63, %v1095_v57  ;;  %vm244_vm14 = vcmp.eq.s32.totalorder %v1107_v0, %v1095_v57  ;;  %vm245_vm15 = vcmp.eq.s32.totalorder %v1110_v1, %v1095_v57  ;;  %v317_v10 = vpop.permute.xlu0 %316 }
  0xdb   :  { %vm318_vm4 = vcmp.eq.s32.totalorder %v1099_v61, %v317_v10  ;;  %vm319_vm5 = vcmp.eq.s32.totalorder %v1104_v63, %v317_v10  ;;  %vm320_vm6 = vcmp.eq.s32.totalorder %v1107_v0, %v317_v10  ;;  %vm321_vm7 = vcmp.eq.s32.totalorder %v1110_v1, %v317_v10 }
  0xdd   :  { %v1097_v59 = vpop.permute.xlu1 %247 }
  0xde   :  { %v250_v58 = vsel %vm242_vm12, %v1097_v59, 0.0  ;;  %v251_v60 = vsel %vm243_vm13, %v1097_v59, 0.0  ;;  %v252_v2 = vsel %vm244_vm14, %v1097_v59, 0.0  ;;  %v253_v4 = vsel %vm245_vm15, %v1097_v59, 0.0 }
  0xdf   :  { %v254_v7 = vadd.f32 %v250_v58, %v235_v51  ;;  %v255_v8 = vadd.f32 %v251_v60, %v236_v52  ;;  %v256_v9 = vadd.f32 %v252_v2, %v237_v53  ;;  %v343_v25 = vpop.permute.xlu0 %342 }
  0xe2   :  { %v1101_v62 = vpop.permute.xlu1 %266 }
  0xe3   :  { %v269_v57 = vsel %vm261_vm8, %v1101_v62, 0.0  ;;  %v270_v59 = vsel %vm262_vm9, %v1101_v62, 0.0  ;;  %v271_v5 = vsel %vm263_vm10, %v1101_v62, 0.0  ;;  %v272_v6 = vsel %vm264_vm11, %v1101_v62, 0.0 }
  0xe4   :  { %v273_v17 = vadd.f32 %v269_v57, %v254_v7  ;;  %v274_v18 = vadd.f32 %v270_v59, %v255_v8  ;;  %v275_v19 = vadd.f32 %v271_v5, %v256_v9  ;;  %v374_v38 = vpop.permute.xlu0 %373 }
  0xe7   :  { %v1112_v3 = vpop.permute.xlu1 %278 }
  0xe8   :  { %vm280_vm0 = vcmp.eq.s32.totalorder %v1099_v61, %v1112_v3  ;;  %vm281_vm1 = vcmp.eq.s32.totalorder %v1104_v63, %v1112_v3  ;;  %vm282_vm2 = vcmp.eq.s32.totalorder %v1107_v0, %v1112_v3  ;;  %vm283_vm3 = vcmp.eq.s32.totalorder %v1110_v1, %v1112_v3 }
  0xe9   :  { %v257_v3 = vadd.f32 %v253_v4, %v238_v54  ;;  %v288_v12 = vsel %vm280_vm0, %v286_v56, 0.0  ;;  %v289_v14 = vsel %vm281_vm1, %v286_v56, 0.0  ;;  %v290_v15 = vsel %vm282_vm2, %v286_v56, 0.0 }
  0xea   :  { %v291_v16 = vsel %vm283_vm3, %v286_v56, 0.0  ;;  %v292_v62 = vadd.f32 %v288_v12, %v273_v17  ;;  %v293_v21 = vadd.f32 %v289_v14, %v274_v18  ;;  %v294_v22 = vadd.f32 %v290_v15, %v275_v19  ;;  %v400_v56 = vpop.permute.xlu0 %399 }
  0xeb   :  { %v276_v20 = vadd.f32 %v272_v6, %v257_v3  ;;  %vm375_vm0 = vcmp.eq.s32.totalorder %v1099_v61, %v374_v38  ;;  %vm376_vm1 = vcmp.eq.s32.totalorder %v1104_v63, %v374_v38  ;;  %vm377_vm2 = vcmp.eq.s32.totalorder %v1107_v0, %v374_v38 }
  0xec   :  { %v1126_v13 = vpop.permute.xlu1 %297  ;;  %vm378_vm3 = vcmp.eq.s32.totalorder %v1110_v1, %v374_v38 }
  0xed   :  { %v295_v23 = vadd.f32 %v291_v16, %v276_v20  ;;  %vm299_vm8 = vcmp.eq.s32.totalorder %v1099_v61, %v1126_v13  ;;  %vm300_vm9 = vcmp.eq.s32.totalorder %v1104_v63, %v1126_v13  ;;  %vm301_vm10 = vcmp.eq.s32.totalorder %v1107_v0, %v1126_v13 }
  0xee   :  { %vm302_vm11 = vcmp.eq.s32.totalorder %v1110_v1, %v1126_v13 }
  0xf0   :  { %v1128_v27 = vpop.permute.xlu1 %304 }
  0xf1   :  { %v307_v26 = vsel %vm299_vm8, %v1128_v27, 0.0  ;;  %v308_v28 = vsel %vm300_vm9, %v1128_v27, 0.0  ;;  %v309_v29 = vsel %vm301_vm10, %v1128_v27, 0.0  ;;  %v310_v30 = vsel %vm302_vm11, %v1128_v27, 0.0 }
  0xf2   :  { %v311_v33 = vadd.f32 %v307_v26, %v292_v62  ;;  %v312_v34 = vadd.f32 %v308_v28, %v293_v21  ;;  %v313_v35 = vadd.f32 %v309_v29, %v294_v22  ;;  %v314_v36 = vadd.f32 %v310_v30, %v295_v23 }
  0xf5   :  { %v1154_v37 = vpop.permute.xlu1 %323 }
  0xf6   :  { %v326_v13 = vsel %vm318_vm4, %v1154_v37, 0.0  ;;  %v327_v27 = vsel %vm319_vm5, %v1154_v37, 0.0  ;;  %v328_v31 = vsel %vm320_vm6, %v1154_v37, 0.0  ;;  %v329_v32 = vsel %vm321_vm7, %v1154_v37, 0.0 }
  0xf7   :  { %v330_v44 = vadd.f32 %v326_v13, %v311_v33  ;;  %v331_v45 = vadd.f32 %v327_v27, %v312_v34  ;;  %v332_v46 = vadd.f32 %v328_v31, %v313_v35  ;;  %v333_v47 = vadd.f32 %v329_v32, %v314_v36 }
  0xfa   :  { %v1160_v55 = vpop.permute.xlu1 %335 }
  0xfb   :  { %vm337_vm12 = vcmp.eq.s32.totalorder %v1099_v61, %v1160_v55  ;;  %vm338_vm13 = vcmp.eq.s32.totalorder %v1104_v63, %v1160_v55  ;;  %vm339_vm14 = vcmp.eq.s32.totalorder %v1107_v0, %v1160_v55  ;;  %vm340_vm15 = vcmp.eq.s32.totalorder %v1110_v1, %v1160_v55 }
  0xfc   :  { %v345_v40 = vsel %vm337_vm12, %v343_v25, 0.0  ;;  %v346_v41 = vsel %vm338_vm13, %v343_v25, 0.0  ;;  %v347_v42 = vsel %vm339_vm14, %v343_v25, 0.0  ;;  %v348_v43 = vsel %vm340_vm15, %v343_v25, 0.0 }
  0xfd   :  { %v349_v37 = vadd.f32 %v345_v40, %v330_v44  ;;  %v350_v48 = vadd.f32 %v346_v41, %v331_v45  ;;  %v351_v49 = vadd.f32 %v347_v42, %v332_v46  ;;  %v352_v50 = vadd.f32 %v348_v43, %v333_v47 }
  0xff   :  { %v1194_v11 = vpop.permute.xlu1 %354 }
 0x100   :  { %vm356_vm4 = vcmp.eq.s32.totalorder %v1099_v61, %v1194_v11  ;;  %vm357_vm5 = vcmp.eq.s32.totalorder %v1104_v63, %v1194_v11  ;;  %vm358_vm6 = vcmp.eq.s32.totalorder %v1107_v0, %v1194_v11  ;;  %vm359_vm7 = vcmp.eq.s32.totalorder %v1110_v1, %v1194_v11 }
 0x103   :  { %v362_v24 = vpop.permute.xlu1 %361 }
 0x104   :  { %v364_v52 = vsel %vm356_vm4, %v362_v24, 0.0  ;;  %v365_v53 = vsel %vm357_vm5, %v362_v24, 0.0  ;;  %v366_v54 = vsel %vm358_vm6, %v362_v24, 0.0  ;;  %v367_v55 = vsel %vm359_vm7, %v362_v24, 0.0 }
 0x105   :  { %v368_v57 = vadd.f32 %v364_v52, %v349_v37  ;;  %v370_v59 = vadd.f32 %v366_v54, %v351_v49  ;;  %v369_v5 = vadd.f32 %v365_v53, %v350_v48  ;;  %v371_v6 = vadd.f32 %v367_v55, %v352_v50 }
 0x108   :  { %v381_v39 = vpop.permute.xlu1 %380 }
 0x109   :  { %v383_v58 = vsel %vm375_vm0, %v381_v39, 0.0  ;;  %v385_v60 = vsel %vm377_vm2, %v381_v39, 0.0  ;;  %v384_v2 = vsel %vm376_vm1, %v381_v39, 0.0  ;;  %v386_v4 = vsel %vm378_vm3, %v381_v39, 0.0 }
 0x10a   :  { %v387_v11 = vadd.f32 %v383_v58, %v368_v57  ;;  %v389_v12 = vadd.f32 %v385_v60, %v370_v59  ;;  %v388_v14 = vadd.f32 %v384_v2, %v369_v5  ;;  %v390_v15 = vadd.f32 %v386_v4, %v371_v6 }
 0x10d   :  { %v393_v51 = vpop.permute.xlu1 %392 }
 0x10e   :  { %vm394_vm8 = vcmp.eq.s32.totalorder %v1099_v61, %v393_v51  ;;  %vm396_vm9 = vcmp.eq.s32.totalorder %v1107_v0, %v393_v51  ;;  %vm395_vm10 = vcmp.eq.s32.totalorder %v1104_v63, %v393_v51  ;;  %vm397_vm11 = vcmp.eq.s32.totalorder %v1110_v1, %v393_v51 }
 0x10f   :  { %v402_v7 = vsel %vm394_vm8, %v400_v56, 0.0  ;;  %v404_v8 = vsel %vm396_vm9, %v400_v56, 0.0  ;;  %v403_v3 = vsel %vm395_vm10, %v400_v56, 0.0  ;;  %v405_v10 = vsel %vm397_vm11, %v400_v56, 0.0 }
 0x110   :  { %v406_v16 = vadd.f32 %v402_v7, %v387_v11  ;;  %v408_v17 = vadd.f32 %v404_v8, %v389_v12  ;;  %v407_v18 = vadd.f32 %v403_v3, %v388_v14  ;;  %v409_v19 = vadd.f32 %v405_v10, %v390_v15 }
 0x112   :  { %v412_v9 = vpop.permute.xlu1 %411 }
 0x113   :  { %vm413_vm12 = vcmp.eq.s32.totalorder %v1099_v61, %v412_v9  ;;  %vm415_vm13 = vcmp.eq.s32.totalorder %v1107_v0, %v412_v9  ;;  %vm414_vm14 = vcmp.eq.s32.totalorder %v1104_v63, %v412_v9  ;;  %vm416_vm15 = vcmp.eq.s32.totalorder %v1110_v1, %v412_v9 }
 0x116   :  { %v419_v20 = vpop.permute.xlu1 %418 }
 0x117   :  { %v421_v62 = vsel %vm413_vm12, %v419_v20, 0.0  ;;  %v423_v21 = vsel %vm415_vm13, %v419_v20, 0.0  ;;  %v422_v22 = vsel %vm414_vm14, %v419_v20, 0.0  ;;  %v424_v23 = vsel %vm416_vm15, %v419_v20, 0.0 }
 0x118   :  { %v426_v24 = vadd.f32 %v422_v22, %v407_v18  ;;  %v428_v25 = vadd.f32 %v424_v23, %v409_v19  ;;  %v425_v26 = vadd.f32 %v421_v62, %v406_v16  ;;  %v427_v28 = vadd.f32 %v423_v21, %v408_v17 }
 0x11a   :  { %v430_v29 = vpack.c.bf16 %v426_v24, %v426_v24  ;;  %v432_v30 = vpack.c.bf16 %v428_v25, %v428_v25  ;;  %v429_v13 = vpack.c.bf16 %v425_v26, %v425_v26  ;;  %v431_v27 = vpack.c.bf16 %v427_v28, %v427_v28 }
 0x11c   :  { %657 = vmatprep.mubr.bf16.mxu0 %v430_v29  ;;  %697 = vmatprep.mubr.bf16.mxu1 %v432_v30 }
 0x11d   :  { %658 = vmatmul.mubr.bf16.vlgmr.msra.gmra.mrb[0].mxu0 %v429_v13  ;;  %698 = vmatmul.mubr.bf16.vlgmr.msra.gmra.mrb[0].mxu1 %v431_v27 }
 0x1f0   :  { %v771_v61 = vpop.f32.mrb[0].mxu0  ;;  %v793_v63 = vpop.f32.mrb[0].mxu1 }
 0x1f1   :  { %v772_v0 = vpop.f32.mrb[1].mxu0  ;;  %v794_v1 = vpop.f32.mrb[1].mxu1 }
 0x1f2   :  { %v773_v31 = vadd.f32 %v772_v0, %v771_v61  ;;  %v795_v32 = vadd.f32 %v794_v1, %v793_v63  ;;  %v774_v33 = vpop.f32.mrb[2].mxu0  ;;  %v796_v34 = vpop.f32.mrb[2].mxu1 }
 0x1f3   :  { %v775_v35 = vpop.f32.mrb[3].mxu0  ;;  %v797_v36 = vpop.f32.mrb[3].mxu1 }
 0x1f4   :  { %v700_v38 = vadd.f32 %v795_v32, %v773_v31 }
 0x1f6   :  { %v705_v39 = vpack.c.bf16 %v700_v38, %v700_v38 }
 0x1f8   :  { %706 = vst [vmem:[#allocation8] sm:$0xf] %v705_v39 }
 0x1f9   :  { %958 = shalt.err (!%p955_p0)
}
 0x1fa   :  { %s959_s25 = scalar_lea.hbm %s1275_s3, 64 }
 0x1fb   :  { %p960_p1 = scmp.ne.s32.totalorder %s1275_s3, %s959_s25  ;;  %p963_p2 = scmp.lt.u32.totalorder %s959_s25, %s1275_s3 }
 0x1fd   :  { %p965_p3 = pnand %p963_p2, %p960_p1 }
 0x1ff   :  { %968 = shalt.err (!%p965_p3)
}
 0x200   :  { %716 = dma.vmem_to_hbm [thread:$0]  %s714_s21, 64, %s1275_s3, [#allocation4]  }
 0x201   :  { %973 = dma.done.wait [#allocation4], 64  }
 0x202   :  { %974 = vsyncadd [#allocation4], 4294967232 }
 0x203   :  { %720 = vsyncpa [#allocation3], 1 }
 0x204   :  { %721 = vsyncpa [#allocation6], 1 }
 0x205   :  { %722 = vsyncpa [#allocation4], 1 }

</bundles_post_ra>
